<compile_context>
chip_gen: v7x
topology: tpu7x:2x2x1
jax: 0.10.0
libtpu: 0.0.40
codegen_flags: <defaults>
</compile_context>

<pallas_src>
import jax
import jax.numpy as jnp
from jax.experimental import pallas as pl
from jax.experimental.pallas import tpu as pltpu


C = 4               # channels
LATENT = 2          # latent_dims
H_IN = W_IN = 28    # input spatial size implied by fc(in_features=4*7*7)

TB_MAX = 256        # batch tile (rows); feeds the MXU full tiles, ~0.44 MB bf16/tile


def _ceil_to(n, m):
    return ((n + m - 1) // m) * m


# Lane-padded GEMM widths (multiples of 128).
K0P = _ceil_to(1 * 28 * 28, 128)   # 784 -> 896   flattened input / conv1 in
N1P = _ceil_to(C * 14 * 14, 128)   # 784 -> 896   conv1 out / conv2 in
N2P = _ceil_to(C * 7 * 7, 128)     # 196 -> 256   conv2/3/4 out, fc in


# ---------------------------------------------------------------------------
# Fused Pallas kernel:
#   out = (relu(relu(relu(relu(x@M1+b1)@M2+b2)@M3+b3)@M4+b4)) @ Wfc + bfc
# All operands lane-padded; padded columns carry exact zeros through the chain.
# ---------------------------------------------------------------------------
def _encoder_fused_kernel(x_ref, m1, b1, m2, b2, m3, b3, m4, b4, wfc, bfc, o_ref):
    def layer(a, m_ref, b_ref, relu):
        acc = jnp.dot(a.astype(m_ref.dtype), m_ref[...],
                      preferred_element_type=jnp.float32)   # bf16 x bf16 -> f32 acc
        acc = acc + b_ref[...]                               # (1, N) broadcast over rows
        return jnp.maximum(acc, 0.0) if relu else acc

    a = x_ref[...]                     # [TB, 896] bf16 (cast done in wrapper)
    a = layer(a, m1, b1, True)         # conv1 -> [TB, 896]
    a = layer(a, m2, b2, True)         # conv2 -> [TB, 256]
    a = layer(a, m3, b3, True)         # conv3 -> [TB, 256]
    a = layer(a, m4, b4, True)         # conv4 -> [TB, 256]
    o_ref[...] = layer(a, wfc, bfc, False).astype(o_ref.dtype)   # fc -> [TB, latent]


# ---------------------------------------------------------------------------
# Init-time weight folding: conv layer -> dense matrix on NCHW-flattened input
# ---------------------------------------------------------------------------
def _conv_as_dense(w, h, width, stride, pad):
    """Dense M s.t. flatten_nchw(conv2d(x)) == flatten_nchw(x) @ M (no bias)."""
    cout, cin, kh, kw = w.shape
    basis = jnp.eye(cin * h * width, dtype=jnp.float32).reshape(cin * h * width, cin, h, width)
    cols = jax.lax.conv_general_dilated(
        basis, w.astype(jnp.float32), (stride, stride),
        [(pad, pad), (pad, pad)],
        dimension_numbers=("NCHW", "OIHW", "NCHW"),
        precision=jax.lax.Precision.HIGHEST)
    return cols.reshape(cin * h * width, -1)     # [Cin*H*W, Cout*Ho*Wo]


def _pad2d(m, rows, cols):
    return jnp.pad(m, ((0, rows - m.shape[0]), (0, cols - m.shape[1])))


def fold_params(params):
    """One-time preprocessing: conv weights -> lane-padded dense bf16 GEMM operands."""
    m1 = _conv_as_dense(params["conv1_w"], 28, 28, 2, 1)    # [784, 784]
    m2 = _conv_as_dense(params["conv2_w"], 14, 14, 2, 1)    # [784, 196]
    m3 = _conv_as_dense(params["conv3_w"], 7, 7, 1, 1)      # [196, 196]
    m4 = _conv_as_dense(params["conv4_w"], 7, 7, 1, 1)      # [196, 196]
    wfc = params["fc_w"].T                                   # [196, L]
    latent = wfc.shape[1]

    dense = {
        # Zero-padded to lane multiples: padded rows/cols are exact zeros, so the
        # padded math is bit-identical to the unpadded chain (ReLU(0)=0).
        "M1": _pad2d(m1, K0P, N1P),                          # [896, 896]
        "M2": _pad2d(m2, N1P, N2P),                          # [896, 256]
        "M3": _pad2d(m3, N2P, N2P),                          # [256, 256]
        "M4": _pad2d(m4, N2P, N2P),                          # [256, 256]
        "Wfc": _pad2d(wfc, N2P, latent),                     # [256, L]
        "b1": _pad2d(jnp.repeat(params["conv1_b"], 14 * 14)[None, :], 1, N1P),
        "b2": _pad2d(jnp.repeat(params["conv2_b"], 7 * 7)[None, :], 1, N2P),
        "b3": _pad2d(jnp.repeat(params["conv3_b"], 7 * 7)[None, :], 1, N2P),
        "b4": _pad2d(jnp.repeat(params["conv4_b"], 7 * 7)[None, :], 1, N2P),
        "bfc": params["fc_b"][None, :],
    }
    for k in ("M1", "M2", "M3", "M4", "Wfc"):
        dense[k] = dense[k].astype(jnp.bfloat16)     # MXU operands
    for k in ("b1", "b2", "b3", "b4", "bfc"):
        dense[k] = dense[k].astype(jnp.float32)      # f32 epilogue
    return dense


# ---------------------------------------------------------------------------
# Forward pass: a single pallas_call
# ---------------------------------------------------------------------------
@jax.jit
def encoder_forward(dense, x_nchw):
    b = x_nchw.shape[0]
    latent = dense["bfc"].shape[-1]
    k_pad = dense["M1"].shape[0]                       # 896

    # NCHW flatten (Cin=1), zero-pad features to the lane-padded width, cast to
    # bf16 (halves per-sample HBM traffic; layer-1 MXU operand is bf16 anyway).
    x2d = x_nchw.reshape(b, -1)
    x2d = jnp.pad(x2d, ((0, 0), (0, k_pad - x2d.shape[1]))).astype(jnp.bfloat16)

    # Batch tiling: big tiles for real batches, round small batches up to a
    # multiple of 8. Padded rows are dead work sliced off at the end.
    tb = TB_MAX if b >= TB_MAX else max(8, _ceil_to(b, 8))
    n_tiles = (b + tb - 1) // tb
    b_pad = n_tiles * tb
    if b_pad != b:
        x2d = jnp.pad(x2d, ((0, b_pad - b), (0, 0)))

    ws = [dense["M1"], dense["b1"], dense["M2"], dense["b2"],
          dense["M3"], dense["b3"], dense["M4"], dense["b4"],
          dense["Wfc"], dense["bfc"]]
    # Constant index_map -> weights stay VMEM-resident across all grid steps.
    # (~2.3 MB bf16; even double-buffered this is nowhere near any VMEM limit,
    #  so we don't force single-buffering.)
    w_specs = [pl.BlockSpec(w.shape, lambda i: (0, 0)) for w in ws]

    out = pl.pallas_call(
        _encoder_fused_kernel,
        out_shape=jax.ShapeDtypeStruct((b_pad, latent), jnp.float32),
        grid=(n_tiles,),
        in_specs=[pl.BlockSpec((tb, k_pad), lambda i: (i, 0))] + w_specs,
        out_specs=pl.BlockSpec((tb, latent), lambda i: (i, 0)),
        compiler_params=pltpu.CompilerParams(
            # Batch tiles are independent -> eligible for multi-core sharding.
            dimension_semantics=("parallel",)),
    )(x2d, *ws)
    return out[:b]


# ---------------------------------------------------------------------------
# References (test-only, plain JAX)
# ---------------------------------------------------------------------------
def encoder_reference(params, x_nchw):
    """Direct translation of the PyTorch Encoder.forward (f32, XLA convs)."""
    def conv(x, w, bias, stride, pad):
        y = jax.lax.conv_general_dilated(
            x, w, (stride, stride), [(pad, pad), (pad, pad)],
            dimension_numbers=("NCHW", "OIHW", "NCHW"),
            precision=jax.lax.Precision.HIGHEST)
        return y + bias[None, :, None, None]

    h = jax.nn.relu(conv(x_nchw, params["conv1_w"], params["conv1_b"], 2, 1))
    h = jax.nn.relu(conv(h, params["conv2_w"], params["conv2_b"], 2, 1))
    h = jax.nn.relu(conv(h, params["conv3_w"], params["conv3_b"], 1, 1))
    h = jax.nn.relu(conv(h, params["conv4_w"], params["conv4_b"], 1, 1))
    h = h.reshape(h.shape[0], -1)                      # == torch .view(B, -1)
    return h @ params["fc_w"].T + params["fc_b"]


def dense_reference(dense, x_nchw):
    """Same math as the kernel (padded bf16 operands, f32 accumulate), via plain jnp."""
    b = x_nchw.shape[0]
    a = x_nchw.reshape(b, -1)
    a = jnp.pad(a, ((0, 0), (0, dense["M1"].shape[0] - a.shape[1]))).astype(jnp.bfloat16)
    for m, bias in (("M1", "b1"), ("M2", "b2"), ("M3", "b3"), ("M4", "b4")):
        a = jax.nn.relu(jnp.dot(a.astype(jnp.bfloat16), dense[m],
                                preferred_element_type=jnp.float32) + dense[bias])
    return jnp.dot(a.astype(jnp.bfloat16), dense["Wfc"],
                   preferred_element_type=jnp.float32) + dense["bfc"]


# ---------------------------------------------------------------------------
# Params
# ---------------------------------------------------------------------------
def init_params(key, c=C, latent_dims=LATENT):
    def u(k, shape, fan_in):
        bound = 1.0 / jnp.sqrt(fan_in)
        return jax.random.uniform(k, shape, jnp.float32, -bound, bound)

    ks = jax.random.split(key, 10)
    return {
        "conv1_w": u(ks[0], (c, 1, 3, 3), 1 * 9), "conv1_b": u(ks[1], (c,), 1 * 9),
        "conv2_w": u(ks[2], (c, c, 3, 3), c * 9), "conv2_b": u(ks[3], (c,), c * 9),
        "conv3_w": u(ks[4], (c, c, 3, 3), c * 9), "conv3_b": u(ks[5], (c,), c * 9),
        "conv4_w": u(ks[6], (c, c, 3, 3), c * 9), "conv4_b": u(ks[7], (c,), c * 9),
        "fc_w": u(ks[8], (latent_dims, c * 7 * 7), c * 7 * 7),
        "fc_b": u(ks[9], (latent_dims,), c * 7 * 7),
    }


if __name__ == "__main__":
    key = jax.random.PRNGKey(0)
    k_param, k_x = jax.random.split(key)
    params = init_params(k_param)

    # Round weights to bf16 once so kernel and reference use identical values
    # (isolates kernel correctness from the intentional bf16 quantization).
    params = {k: (v.astype(jnp.bfloat16).astype(jnp.float32) if k.endswith("_w") else v)
              for k, v in params.items()}

    dense = fold_params(params)      # one-time weight folding (init-time, not hot path)

    # Input implied by the module: 1 channel, 28x28 (fc expects 4*7*7), batch 2.
    x = jax.random.normal(k_x, (2, 1, H_IN, W_IN), dtype=jnp.float32)

    out = jax.block_until_ready(encoder_forward(dense, x))
    assert out.shape == (2, LATENT) and out.dtype == jnp.float32, (out.shape, out.dtype)

    # Check A (tight): Pallas kernel vs identical-math jnp GEMM chain.
    ref_same = dense_reference(dense, x)
    assert jnp.allclose(out, ref_same, atol=2e-3, rtol=0.0), \
        float(jnp.max(jnp.abs(out - ref_same)))

    # Check B (semantics): vs direct conv/Linear reference of the PyTorch forward.
    ref = encoder_reference(params, x)
    assert jnp.allclose(out, ref, atol=1e-2, rtol=0.0), \
        float(jnp.max(jnp.abs(out - ref)))

    print("KERNEL_OK")
</pallas_src>

<mosaic_0001>
module attributes {stable_mosaic.version = 11 : i64} {
  func.func @_encoder_fused_kernel(%arg0: i32, %arg1: memref<8x896xbf16, #tpu.memory_space<vmem>>, %arg2: memref<896x896xbf16, #tpu.memory_space<vmem>>, %arg3: memref<1x896xf32, #tpu.memory_space<vmem>>, %arg4: memref<896x256xbf16, #tpu.memory_space<vmem>>, %arg5: memref<1x256xf32, #tpu.memory_space<vmem>>, %arg6: memref<256x256xbf16, #tpu.memory_space<vmem>>, %arg7: memref<1x256xf32, #tpu.memory_space<vmem>>, %arg8: memref<256x256xbf16, #tpu.memory_space<vmem>>, %arg9: memref<1x256xf32, #tpu.memory_space<vmem>>, %arg10: memref<256x2xbf16, #tpu.memory_space<vmem>>, %arg11: memref<1x2xf32, #tpu.memory_space<vmem>>, %arg12: memref<8x2xf32, #tpu.memory_space<vmem>>) attributes {dimension_semantics = [#tpu.dimension_semantics<parallel>], iteration_bounds = array<i64: 1>, scalar_prefetch = 0 : i64, scratch_operands = 0 : i64, tpu.core_type = #tpu.core_type<tc>, window_params = [{transform_indices = @transform_0, window_bounds = array<i64: 8, 896>}, {pipeline_mode = #tpu.pipeline_mode<synchronous>, transform_indices = @transform_1, window_bounds = array<i64: 896, 896>}, {pipeline_mode = #tpu.pipeline_mode<synchronous>, transform_indices = @transform_2, window_bounds = array<i64: 1, 896>}, {pipeline_mode = #tpu.pipeline_mode<synchronous>, transform_indices = @transform_3, window_bounds = array<i64: 896, 256>}, {pipeline_mode = #tpu.pipeline_mode<synchronous>, transform_indices = @transform_4, window_bounds = array<i64: 1, 256>}, {pipeline_mode = #tpu.pipeline_mode<synchronous>, transform_indices = @transform_5, window_bounds = array<i64: 256, 256>}, {pipeline_mode = #tpu.pipeline_mode<synchronous>, transform_indices = @transform_6, window_bounds = array<i64: 1, 256>}, {pipeline_mode = #tpu.pipeline_mode<synchronous>, transform_indices = @transform_7, window_bounds = array<i64: 256, 256>}, {pipeline_mode = #tpu.pipeline_mode<synchronous>, transform_indices = @transform_8, window_bounds = array<i64: 1, 256>}, {pipeline_mode = #tpu.pipeline_mode<synchronous>, transform_indices = @transform_9, window_bounds = array<i64: 256, 2>}, {pipeline_mode = #tpu.pipeline_mode<synchronous>, transform_indices = @transform_10, window_bounds = array<i64: 1, 2>}, {transform_indices = @transform_11, window_bounds = array<i64: 8, 2>}]} {
    %c0 = arith.constant 0 : index
    %c0_0 = arith.constant 0 : index
    %0 = vector.load %arg1[%c0, %c0_0] : memref<8x896xbf16, #tpu.memory_space<vmem>>, vector<8x896xbf16>
    %c0_1 = arith.constant 0 : index
    %c0_2 = arith.constant 0 : index
    %1 = vector.load %arg2[%c0_1, %c0_2] : memref<896x896xbf16, #tpu.memory_space<vmem>>, vector<896x896xbf16>
    %cst = arith.constant dense<0.000000e+00> : vector<8x896xf32>
    %2 = tpu.matmul %0, %1, %cst {dimension_numbers = #tpu.dot_dimension_numbers<[1], [0], [0], [1], [0, 0, 1, 1], [], []>} : vector<8x896xbf16>, vector<896x896xbf16>, vector<8x896xf32> -> vector<8x896xf32>
    %c0_3 = arith.constant 0 : index
    %c0_4 = arith.constant 0 : index
    %3 = vector.load %arg3[%c0_3, %c0_4] : memref<1x896xf32, #tpu.memory_space<vmem>>, vector<1x896xf32>
    %4 = vector.broadcast %3 : vector<1x896xf32> to vector<8x896xf32>
    %5 = arith.addf %2, %4 : vector<8x896xf32>
    %cst_5 = arith.constant 0.000000e+00 : f32
    %6 = vector.broadcast %cst_5 : f32 to vector<8x896xf32>
    %7 = arith.maximumf %5, %6 : vector<8x896xf32>
    %8 = arith.truncf %7 : vector<8x896xf32> to vector<8x896xbf16>
    %c0_6 = arith.constant 0 : index
    %c0_7 = arith.constant 0 : index
    %9 = vector.load %arg4[%c0_6, %c0_7] : memref<896x256xbf16, #tpu.memory_space<vmem>>, vector<896x256xbf16>
    %cst_8 = arith.constant dense<0.000000e+00> : vector<8x256xf32>
    %10 = tpu.matmul %8, %9, %cst_8 {dimension_numbers = #tpu.dot_dimension_numbers<[1], [0], [0], [1], [0, 0, 1, 1], [], []>} : vector<8x896xbf16>, vector<896x256xbf16>, vector<8x256xf32> -> vector<8x256xf32>
    %c0_9 = arith.constant 0 : index
    %c0_10 = arith.constant 0 : index
    %11 = vector.load %arg5[%c0_9, %c0_10] : memref<1x256xf32, #tpu.memory_space<vmem>>, vector<1x256xf32>
    %12 = vector.broadcast %11 : vector<1x256xf32> to vector<8x256xf32>
    %13 = arith.addf %10, %12 : vector<8x256xf32>
    %cst_11 = arith.constant 0.000000e+00 : f32
    %14 = vector.broadcast %cst_11 : f32 to vector<8x256xf32>
    %15 = arith.maximumf %13, %14 : vector<8x256xf32>
    %16 = arith.truncf %15 : vector<8x256xf32> to vector<8x256xbf16>
    %c0_12 = arith.constant 0 : index
    %c0_13 = arith.constant 0 : index
    %17 = vector.load %arg6[%c0_12, %c0_13] : memref<256x256xbf16, #tpu.memory_space<vmem>>, vector<256x256xbf16>
    %cst_14 = arith.constant dense<0.000000e+00> : vector<8x256xf32>
    %18 = tpu.matmul %16, %17, %cst_14 {dimension_numbers = #tpu.dot_dimension_numbers<[1], [0], [0], [1], [0, 0, 1, 1], [], []>} : vector<8x256xbf16>, vector<256x256xbf16>, vector<8x256xf32> -> vector<8x256xf32>
    %c0_15 = arith.constant 0 : index
    %c0_16 = arith.constant 0 : index
    %19 = vector.load %arg7[%c0_15, %c0_16] : memref<1x256xf32, #tpu.memory_space<vmem>>, vector<1x256xf32>
    %20 = vector.broadcast %19 : vector<1x256xf32> to vector<8x256xf32>
    %21 = arith.addf %18, %20 : vector<8x256xf32>
    %cst_17 = arith.constant 0.000000e+00 : f32
    %22 = vector.broadcast %cst_17 : f32 to vector<8x256xf32>
    %23 = arith.maximumf %21, %22 : vector<8x256xf32>
    %24 = arith.truncf %23 : vector<8x256xf32> to vector<8x256xbf16>
    %c0_18 = arith.constant 0 : index
    %c0_19 = arith.constant 0 : index
    %25 = vector.load %arg8[%c0_18, %c0_19] : memref<256x256xbf16, #tpu.memory_space<vmem>>, vector<256x256xbf16>
    %cst_20 = arith.constant dense<0.000000e+00> : vector<8x256xf32>
    %26 = tpu.matmul %24, %25, %cst_20 {dimension_numbers = #tpu.dot_dimension_numbers<[1], [0], [0], [1], [0, 0, 1, 1], [], []>} : vector<8x256xbf16>, vector<256x256xbf16>, vector<8x256xf32> -> vector<8x256xf32>
    %c0_21 = arith.constant 0 : index
    %c0_22 = arith.constant 0 : index
    %27 = vector.load %arg9[%c0_21, %c0_22] : memref<1x256xf32, #tpu.memory_space<vmem>>, vector<1x256xf32>
    %28 = vector.broadcast %27 : vector<1x256xf32> to vector<8x256xf32>
    %29 = arith.addf %26, %28 : vector<8x256xf32>
    %cst_23 = arith.constant 0.000000e+00 : f32
    %30 = vector.broadcast %cst_23 : f32 to vector<8x256xf32>
    %31 = arith.maximumf %29, %30 : vector<8x256xf32>
    %32 = arith.truncf %31 : vector<8x256xf32> to vector<8x256xbf16>
    %c0_24 = arith.constant 0 : index
    %c0_25 = arith.constant 0 : index
    %33 = vector.load %arg10[%c0_24, %c0_25] : memref<256x2xbf16, #tpu.memory_space<vmem>>, vector<256x2xbf16>
    %cst_26 = arith.constant dense<0.000000e+00> : vector<8x2xf32>
    %34 = tpu.matmul %32, %33, %cst_26 {dimension_numbers = #tpu.dot_dimension_numbers<[1], [0], [0], [1], [0, 0, 1, 1], [], []>} : vector<8x256xbf16>, vector<256x2xbf16>, vector<8x2xf32> -> vector<8x2xf32>
    %c0_27 = arith.constant 0 : index
    %c0_28 = arith.constant 0 : index
    %35 = vector.load %arg11[%c0_27, %c0_28] : memref<1x2xf32, #tpu.memory_space<vmem>>, vector<1x2xf32>
    %36 = vector.broadcast %35 : vector<1x2xf32> to vector<8x2xf32>
    %37 = arith.addf %34, %36 : vector<8x2xf32>
    %c0_29 = arith.constant 0 : index
    %c0_30 = arith.constant 0 : index
    %38 = vector.load %arg12[%c0_29, %c0_30] : memref<8x2xf32, #tpu.memory_space<vmem>>, vector<8x2xf32>
    tpu.vector_store %arg12[%c0_29, %c0_30], %37 {strides = array<i32>} : memref<8x2xf32, #tpu.memory_space<vmem>>, vector<8x2xf32>,
    return
  }
  func.func @transform_0(%arg0: i32) -> (i32, i32) {
    %c0_i32 = arith.constant 0 : i32
    %c0_i32_0 = arith.constant 0 : i32
    return %arg0, %c0_i32 : i32, i32
  }
  func.func @transform_1(%arg0: i32) -> (i32, i32) {
    %c0_i32 = arith.constant 0 : i32
    %c0_i32_0 = arith.constant 0 : i32
    %c0_i32_1 = arith.constant 0 : i32
    return %c0_i32, %c0_i32_0 : i32, i32
  }
  func.func @transform_2(%arg0: i32) -> (i32, i32) {
    %c0_i32 = arith.constant 0 : i32
    %c0_i32_0 = arith.constant 0 : i32
    %c0_i32_1 = arith.constant 0 : i32
    return %c0_i32, %c0_i32_0 : i32, i32
  }
  func.func @transform_3(%arg0: i32) -> (i32, i32) {
    %c0_i32 = arith.constant 0 : i32
    %c0_i32_0 = arith.constant 0 : i32
    %c0_i32_1 = arith.constant 0 : i32
    return %c0_i32, %c0_i32_0 : i32, i32
  }
  func.func @transform_4(%arg0: i32) -> (i32, i32) {
    %c0_i32 = arith.constant 0 : i32
    %c0_i32_0 = arith.constant 0 : i32
    %c0_i32_1 = arith.constant 0 : i32
    return %c0_i32, %c0_i32_0 : i32, i32
  }
  func.func @transform_5(%arg0: i32) -> (i32, i32) {
    %c0_i32 = arith.constant 0 : i32
    %c0_i32_0 = arith.constant 0 : i32
    %c0_i32_1 = arith.constant 0 : i32
    return %c0_i32, %c0_i32_0 : i32, i32
  }
  func.func @transform_6(%arg0: i32) -> (i32, i32) {
    %c0_i32 = arith.constant 0 : i32
    %c0_i32_0 = arith.constant 0 : i32
    %c0_i32_1 = arith.constant 0 : i32
    return %c0_i32, %c0_i32_0 : i32, i32
  }
  func.func @transform_7(%arg0: i32) -> (i32, i32) {
    %c0_i32 = arith.constant 0 : i32
    %c0_i32_0 = arith.constant 0 : i32
    %c0_i32_1 = arith.constant 0 : i32
    return %c0_i32, %c0_i32_0 : i32, i32
  }
  func.func @transform_8(%arg0: i32) -> (i32, i32) {
    %c0_i32 = arith.constant 0 : i32
    %c0_i32_0 = arith.constant 0 : i32
    %c0_i32_1 = arith.constant 0 : i32
    return %c0_i32, %c0_i32_0 : i32, i32
  }
  func.func @transform_9(%arg0: i32) -> (i32, i32) {
    %c0_i32 = arith.constant 0 : i32
    %c0_i32_0 = arith.constant 0 : i32
    %c0_i32_1 = arith.constant 0 : i32
    return %c0_i32, %c0_i32_0 : i32, i32
  }
  func.func @transform_10(%arg0: i32) -> (i32, i32) {
    %c0_i32 = arith.constant 0 : i32
    %c0_i32_0 = arith.constant 0 : i32
    %c0_i32_1 = arith.constant 0 : i32
    return %c0_i32, %c0_i32_0 : i32, i32
  }
  func.func @transform_11(%arg0: i32) -> (i32, i32) {
    %c0_i32 = arith.constant 0 : i32
    %c0_i32_0 = arith.constant 0 : i32
    return %arg0, %c0_i32 : i32, i32
  }
}

</mosaic_0001>

<bundles_post_ra>
// kernel: encoder_forward.1
= control target key start
LH: loop header
LB: loop body
LE: loop exit
PB: predicated region body
PF: predicated region fallthrough
CT: control target
= control target key end

     0   :  { %16 = vsyncpa [#allocation3], 0  ;;  %s7078_s0 = inlined_call_operand.vmem [shape: bf16[8,896], index: 0, kind: input, shape index: {}]   ;;  %s7079_s1 = inlined_call_operand.hbm [shape: bf16[896,896], index: 1, kind: input, shape index: {}]   ;;  %s7080_s2 = inlined_call_operand.hbm [shape: f32[1,896], index: 2, kind: input, shape index: {}]   ;;  %s7081_s3 = inlined_call_operand.hbm [shape: bf16[896,256], index: 3, kind: input, shape index: {}]   ;;  %s7082_s4 = inlined_call_operand.hbm [shape: f32[1,256], index: 4, kind: input, shape index: {}]   ;;  %s7083_s5 = inlined_call_operand.hbm [shape: bf16[256,256], index: 5, kind: input, shape index: {}]   ;;  %s7084_s6 = inlined_call_operand.hbm [shape: f32[1,256], index: 6, kind: input, shape index: {}]   ;;  %s7085_s7 = inlined_call_operand.hbm [shape: bf16[256,256], index: 7, kind: input, shape index: {}]   ;;  %s7086_s8 = inlined_call_operand.hbm [shape: f32[1,256], index: 8, kind: input, shape index: {}]   ;;  %s7087_s9 = inlined_call_operand.vmem [shape: bf16[256,2], index: 9, kind: input, shape index: {}]   ;;  %s7088_s10 = inlined_call_operand.hbm [shape: f32[1,2], index: 10, kind: input, shape index: {}]   ;;  %s7089_s11 = inlined_call_operand.vmem [shape: f32[8,2], index: 11, kind: output, shape index: {}]  }
   0x1   :  { %17 = vsyncpa [#allocation5], 0 }
   0x2   :  { %18 = vsyncpa [#allocation8], 0 }
   0x3   :  { %19 = vsyncpa [#allocation11], 0 }
   0x4   :  { %20 = vsyncpa [#allocation14], 0  ;;  %s6720_s17 = smov [#allocation4]   ;;  %s6721_s19 = smov [#allocation7]  }
   0x5   :  { %s41_s18 = sshll.u32 %s6720_s17, 4  ;;  %s63_s20 = sshll.u32 %s6721_s19, 4  ;;  %s42_s18 = int_to_ptr.vmem [resolvable:$true] %s41_s18  ;;  %s64_s20 = int_to_ptr.vmem [resolvable:$true] %s63_s20 }
   0x6   :  { %s6512_s23 = scalar_lea.hbm %s7080_s2, 112 }
   0x7   :  { %p6513_p0 = scmp.ne.s32.totalorder %s7080_s2, %s6512_s23  ;;  %p6516_p1 = scmp.lt.u32.totalorder %s6512_s23, %s7080_s2 }
   0x9   :  { %p6518_p2 = pnand %p6516_p1, %p6513_p0 }
   0xb   :  { %6521 = shalt.err (!%p6518_p2)
}
   0xc   :  { %s6522_s28 = scalar_lea.vmem %s42_s18, 112  ;;  %s6526_s29 = scalar_lea.vmem %s42_s18, 128 }
   0xd   :  { %p6523_p3 = scmp.ne.s32.totalorder %s42_s18, %s6522_s28  ;;  %p6527_p4 = scmp.lt.s32.totalorder %s42_s18, %s42_s18 }
   0xe   :  { %p6528_p5 = scmp.lt.s32.totalorder %s6526_s29, %s6522_s28 }
  0x10   :  { %p6529_p6 = por %p6528_p5, %p6527_p4 }
  0x12   :  { %p6530_p7 = pnand %p6529_p6, %p6523_p3 }
  0x14   :  { %6533 = shalt.err (!%p6530_p7)
}
  0x15   :  { %44 = dma.hbm_to_vmem [thread:$0]  %s7080_s2, 112, %s42_s18, [#allocation5]  }
  0x16   :  { %s6534_s15 = scalar_lea.hbm %s7082_s4, 32 }
  0x17   :  { %p6535_p8 = scmp.ne.s32.totalorder %s7082_s4, %s6534_s15  ;;  %p6538_p9 = scmp.lt.u32.totalorder %s6534_s15, %s7082_s4 }
  0x19   :  { %p6540_p10 = pnand %p6538_p9, %p6535_p8 }
  0x1b   :  { %6543 = shalt.err (!%p6540_p10)
}
  0x1c   :  { %s6544_s22 = scalar_lea.vmem %s64_s20, 32  ;;  %p6549_p12 = scmp.lt.s32.totalorder %s64_s20, %s64_s20 }
  0x1d   :  { %p6545_p11 = scmp.ne.s32.totalorder %s64_s20, %s6544_s22  ;;  %p6550_p13 = scmp.lt.s32.totalorder %s6544_s22, %s6544_s22 }
  0x1f   :  { %p6551_p0 = por %p6550_p13, %p6549_p12 }
  0x21   :  { %p6552_p1 = pnand %p6551_p0, %p6545_p11 }
  0x23   :  { %6555 = shalt.err (!%p6552_p1)
}
  0x24   :  { %66 = dma.hbm_to_vmem [thread:$0]  %s7082_s4, 32, %s64_s20, [#allocation8]  }
  0x25   :  { %s6722_s23 = smov [#allocation10]   ;;  %s6723_s25 = smov [#allocation13]  }
  0x26   :  { %s85_s24 = sshll.u32 %s6722_s23, 4  ;;  %s107_s26 = sshll.u32 %s6723_s25, 4  ;;  %s86_s24 = int_to_ptr.vmem [resolvable:$true] %s85_s24  ;;  %s108_s26 = int_to_ptr.vmem [resolvable:$true] %s107_s26 }
  0x27   :  { %s6556_s29 = scalar_lea.hbm %s7084_s6, 32 }
  0x28   :  { %p6557_p2 = scmp.ne.s32.totalorder %s7084_s6, %s6556_s29  ;;  %p6560_p3 = scmp.lt.u32.totalorder %s6556_s29, %s7084_s6 }
  0x2a   :  { %p6562_p4 = pnand %p6560_p3, %p6557_p2 }
  0x2c   :  { %6565 = shalt.err (!%p6562_p4)
}
  0x2d   :  { %s6566_s4 = scalar_lea.vmem %s86_s24, 32  ;;  %p6571_p6 = scmp.lt.s32.totalorder %s86_s24, %s86_s24 }
  0x2e   :  { %p6567_p5 = scmp.ne.s32.totalorder %s86_s24, %s6566_s4  ;;  %p6572_p7 = scmp.lt.s32.totalorder %s6566_s4, %s6566_s4 }
  0x30   :  { %p6573_p8 = por %p6572_p7, %p6571_p6 }
  0x32   :  { %p6574_p9 = pnand %p6573_p8, %p6567_p5 }
  0x34   :  { %6577 = shalt.err (!%p6574_p9)
}
  0x35   :  { %88 = dma.hbm_to_vmem [thread:$0]  %s7084_s6, 32, %s86_s24, [#allocation11]  }
  0x36   :  { %s6578_s19 = scalar_lea.hbm %s7086_s8, 32 }
  0x37   :  { %p6579_p10 = scmp.ne.s32.totalorder %s7086_s8, %s6578_s19  ;;  %p6582_p11 = scmp.lt.u32.totalorder %s6578_s19, %s7086_s8 }
  0x39   :  { %p6584_p12 = pnand %p6582_p11, %p6579_p10 }
  0x3b   :  { %6587 = shalt.err (!%p6584_p12)
}
  0x3c   :  { %s6588_s23 = scalar_lea.vmem %s108_s26, 32  ;;  %p6593_p0 = scmp.lt.s32.totalorder %s108_s26, %s108_s26 }
  0x3d   :  { %p6589_p13 = scmp.ne.s32.totalorder %s108_s26, %s6588_s23  ;;  %p6594_p1 = scmp.lt.s32.totalorder %s6588_s23, %s6588_s23 }
  0x3f   :  { %p6595_p2 = por %p6594_p1, %p6593_p0 }
  0x41   :  { %p6596_p3 = pnand %p6595_p2, %p6589_p13 }
  0x43   :  { %6599 = shalt.err (!%p6596_p3)
}
  0x44   :  { %110 = dma.hbm_to_vmem [thread:$0]  %s7086_s8, 32, %s108_s26, [#allocation14]  }
  0x45   :  { %s6724_s25 = smov [#allocation2]   ;;  %s6600_s30 = scalar_lea.hbm %s7079_s1, 50176 }
  0x46   :  { %s28_s27 = sshll.u32 %s6724_s25, 4  ;;  %p6601_p4 = scmp.ne.s32.totalorder %s7079_s1, %s6600_s30  ;;  %s29_s27 = int_to_ptr.vmem [resolvable:$true] %s28_s27 }
  0x47   :  { %p6604_p5 = scmp.lt.u32.totalorder %s6600_s30, %s7079_s1 }
  0x49   :  { %p6606_p6 = pnand %p6604_p5, %p6601_p4 }
  0x4b   :  { %6609 = shalt.err (!%p6606_p6)
}
  0x4c   :  { %s6610_s20 = scalar_lea.vmem %s29_s27, 50176  ;;  %p6615_p8 = scmp.lt.s32.totalorder %s29_s27, %s29_s27 }
  0x4d   :  { %p6611_p7 = scmp.ne.s32.totalorder %s29_s27, %s6610_s20  ;;  %p6616_p9 = scmp.lt.s32.totalorder %s6610_s20, %s6610_s20 }
  0x4f   :  { %p6617_p10 = por %p6616_p9, %p6615_p8 }
  0x51   :  { %p6618_p11 = pnand %p6617_p10, %p6611_p7 }
  0x53   :  { %6621 = shalt.err (!%p6618_p11)
}
  0x54   :  { %s6725_s8 = smov 448   ;;  %s6726_s26 = smov 28  }
  0x55   :  { %34 = dma.hbm_to_vmem [thread:$0]  %s7079_s1, 50176, %s29_s27, [#allocation3], %s6725_s8, %s6725_s8, %s6726_s26  }
  0x56   :  { %s6727_s17 = smov [#allocation6]   ;;  %s6622_s2 = scalar_lea.hbm %s7081_s3, 14336 }
  0x57   :  { %s50_s19 = sshll.u32 %s6727_s17, 4  ;;  %p6623_p12 = scmp.ne.s32.totalorder %s7081_s3, %s6622_s2  ;;  %s51_s19 = int_to_ptr.vmem [resolvable:$true] %s50_s19 }
  0x58   :  { %p6626_p13 = scmp.lt.u32.totalorder %s6622_s2, %s7081_s3 }
  0x5a   :  { %p6628_p0 = pnand %p6626_p13, %p6623_p12 }
  0x5c   :  { %6631 = shalt.err (!%p6628_p0)
}
  0x5d   :  { %s6632_s25 = scalar_lea.vmem %s51_s19, 14336  ;;  %p6637_p2 = scmp.lt.s32.totalorder %s51_s19, %s51_s19 }
  0x5e   :  { %p6633_p1 = scmp.ne.s32.totalorder %s51_s19, %s6632_s25  ;;  %p6638_p3 = scmp.lt.s32.totalorder %s6632_s25, %s6632_s25 }
  0x60   :  { %p6639_p4 = por %p6638_p3, %p6637_p2 }
  0x62   :  { %p6640_p5 = pnand %p6639_p4, %p6633_p1 }
  0x64   :  { %6643 = shalt.err (!%p6640_p5)
}
  0x65   :  { %s6728_s1 = smov 128   ;;  %s6729_s27 = smov 8  }
  0x66   :  { %56 = dma.hbm_to_vmem [thread:$0]  %s7081_s3, 14336, %s51_s19, [#allocation5], %s6728_s1, %s6728_s1, %s6729_s27  }
  0x67   :  { %s6730_s30 = smov [#allocation9]   ;;  %s6731_s13 = smov [#allocation12]  }
  0x68   :  { %s72_s12 = sshll.u32 %s6730_s30, 4  ;;  %s94_s14 = sshll.u32 %s6731_s13, 4  ;;  %s73_s12 = int_to_ptr.vmem [resolvable:$true] %s72_s12  ;;  %s6871_s14 = int_to_ptr.vmem [resolvable:$true] %s94_s14 }
  0x69   :  { %s6644_s8 = scalar_lea.hbm %s7083_s5, 4096 }
  0x6a   :  { %p6645_p6 = scmp.ne.s32.totalorder %s7083_s5, %s6644_s8  ;;  %p6648_p7 = scmp.lt.u32.totalorder %s6644_s8, %s7083_s5 }
  0x6c   :  { %p6650_p8 = pnand %p6648_p7, %p6645_p6 }
  0x6e   :  { %6653 = shalt.err (!%p6650_p8)
}
  0x6f   :  { %s6654_s3 = scalar_lea.vmem %s73_s12, 4096  ;;  %p6659_p10 = scmp.lt.s32.totalorder %s73_s12, %s73_s12 }
  0x70   :  { %p6655_p9 = scmp.ne.s32.totalorder %s73_s12, %s6654_s3  ;;  %p6660_p11 = scmp.lt.s32.totalorder %s6654_s3, %s6654_s3 }
  0x72   :  { %p6661_p12 = por %p6660_p11, %p6659_p10 }
  0x74   :  { %p6662_p13 = pnand %p6661_p12, %p6655_p9 }
  0x76   :  { %6665 = shalt.err (!%p6662_p13)
}
  0x77   :  { %78 = dma.hbm_to_vmem [thread:$0]  %s7083_s5, 4096, %s73_s12, [#allocation8], %s6728_s1, %s6728_s1, %s6729_s27  }
  0x78   :  { %s6666_s18 = scalar_lea.hbm %s7085_s7, 4096 }
  0x79   :  { %p6667_p0 = scmp.ne.s32.totalorder %s7085_s7, %s6666_s18  ;;  %p6670_p1 = scmp.lt.u32.totalorder %s6666_s18, %s7085_s7 }
  0x7b   :  { %p6672_p2 = pnand %p6670_p1, %p6667_p0 }
  0x7d   :  { %6675 = shalt.err (!%p6672_p2)
}
  0x7e   :  { %s6676_s28 = scalar_lea.vmem %s6871_s14, 4096  ;;  %p6681_p4 = scmp.lt.s32.totalorder %s6871_s14, %s6871_s14 }
  0x7f   :  { %p6677_p3 = scmp.ne.s32.totalorder %s6871_s14, %s6676_s28  ;;  %p6682_p5 = scmp.lt.s32.totalorder %s6676_s28, %s6676_s28 }
  0x81   :  { %p6683_p6 = por %p6682_p5, %p6681_p4 }
  0x83   :  { %p6684_p7 = pnand %p6683_p6, %p6677_p3 }
  0x85   :  { %6687 = shalt.err (!%p6684_p7)
}
  0x86   :  { %100 = dma.hbm_to_vmem [thread:$0]  %s7085_s7, 4096, %s6871_s14, [#allocation11], %s6728_s1, %s6728_s1, %s6729_s27  }
  0x87   :  { %s6732_s30 = smov [#allocation15]   ;;  %s6688_s20 = scalar_lea.hbm %s7088_s10, 16 }
  0x88   :  { %s119_s12 = sshll.u32 %s6732_s30, 4  ;;  %p6689_p8 = scmp.ne.s32.totalorder %s7088_s10, %s6688_s20  ;;  %s120_s12 = int_to_ptr.vmem [resolvable:$true] %s119_s12 }
  0x89   :  { %p6692_p9 = scmp.lt.u32.totalorder %s6688_s20, %s7088_s10 }
  0x8b   :  { %p6694_p10 = pnand %p6692_p9, %p6689_p8 }
  0x8d   :  { %6697 = shalt.err (!%p6694_p10)
}
  0x8e   :  { %s6698_s17 = scalar_lea.vmem %s120_s12, 16  ;;  %s6702_s7 = scalar_lea.vmem %s120_s12, 32 }
  0x8f   :  { %p6699_p11 = scmp.ne.s32.totalorder %s120_s12, %s6698_s17  ;;  %p6703_p12 = scmp.lt.s32.totalorder %s120_s12, %s120_s12 }
  0x90   :  { %p6704_p13 = scmp.lt.s32.totalorder %s6702_s7, %s6698_s17 }
  0x92   :  { %p6705_p0 = por %p6704_p13, %p6703_p12 }
  0x94   :  { %p6706_p1 = pnand %p6705_p0, %p6699_p11 }
  0x96   :  { %6709 = shalt.err (!%p6706_p1)
}
  0x97   :  { %122 = dma.hbm_to_vmem [thread:$0]  %s7088_s10, 16, %s120_s12, [#allocation14]  }
  0x98   :  { %6710 = dma.done.wait [#allocation3], 50176  }
  0x99   :  { %6711 = vsyncadd [#allocation3], 4294917120 }
  0x9a   :  { %6712 = dma.done.wait [#allocation5], 14448  }
  0x9b   :  { %6713 = vsyncadd [#allocation5], 4294952848 }
  0x9c   :  { %6714 = dma.done.wait [#allocation8], 4128  }
  0x9d   :  { %6715 = vsyncadd [#allocation8], 4294963168 }
  0x9e   :  { %6716 = dma.done.wait [#allocation11], 4128  }
  0x9f   :  { %6717 = vsyncadd [#allocation11], 4294963168 }
  0xa0   :  { %6718 = dma.done.wait [#allocation14], 48  }
  0xa1   :  { %6719 = vsyncadd [#allocation14], 4294967248  ;;  %v5664_v0 = vld [vmem:[#allocation2 + $0x4] ss:$28 sps:$4 sm:$0xff]   ;;  %v5666_v1 = vld [vmem:[#allocation2 + $0xc] ss:$28 sps:$4 sm:$0xff]  }
  0xa2   :  { %2681 = vmatprep.subr.bf16.mxu0 %v5664_v0  ;;  %v5668_v2 = vld [vmem:[#allocation2] ss:$28 sps:$4 sm:$0xff]   ;;  %v5669_v3 = vld [vmem:[#allocation2 + $0x8] ss:$28 sps:$4 sm:$0xff]   ;;  %2845 = vmatprep.subr.bf16.mxu1 %v5666_v1  ;;  %v5674_v6 = vld [vmem:[#allocation2 + $0x38] ss:$28 sps:$4 sm:$0xff]  }
  0xa3   :  { %v5670_v4 = vld [vmem:[#allocation2 + $0x3c] ss:$28 sps:$4 sm:$0xff]   ;;  %2682 = vmatpush1.bf16.msra.mxu0 %v5668_v2  ;;  %2846 = vmatpush1.bf16.msra.mxu1 %v5669_v3  ;;  %v5672_v5 = vld [vmem:[#allocation2 + $0x44] ss:$28 sps:$4 sm:$0xff]   ;;  %v5676_v8 = vld [vmem:[#allocation2 + $0x74] ss:$28 sps:$4 sm:$0xff]  }
  0xa4   :  { %2683 = vmatprep.subr.bf16.mxu0 %v5670_v4  ;;  %v5675_v7 = vld [vmem:[#allocation2 + $0x40] ss:$28 sps:$4 sm:$0xff]   ;;  %2847 = vmatprep.subr.bf16.mxu1 %v5672_v5  ;;  %v5680_v10 = vld [vmem:[#allocation2 + $0x70] ss:$28 sps:$4 sm:$0xff]   ;;  %v5681_v11 = vld [vmem:[#allocation2 + $0x78] ss:$28 sps:$4 sm:$0xff]  }
  0xa5   :  { %v5678_v9 = vld [vmem:[#allocation2 + $0x7c] ss:$28 sps:$4 sm:$0xff]   ;;  %v5682_v12 = vld [vmem:[#allocation2 + $0xac] ss:$28 sps:$4 sm:$0xff]   ;;  %v5684_v13 = vld [vmem:[#allocation2 + $0xb4] ss:$28 sps:$4 sm:$0xff]  }
  0xa6   :  { %v5686_v14 = vld [vmem:[#allocation2 + $0xa8] ss:$28 sps:$4 sm:$0xff]   ;;  %v5687_v15 = vld [vmem:[#allocation2 + $0xb0] ss:$28 sps:$4 sm:$0xff]   ;;  %v5692_v18 = vld [vmem:[#allocation2 + $0xe0] ss:$28 sps:$4 sm:$0xff]  }
  0xa7   :  { %2684 = vmatpush1.bf16.msra.mxu0 %v5674_v6  ;;  %2848 = vmatpush1.bf16.msra.mxu1 %v5675_v7  ;;  %v5688_v16 = vld [vmem:[#allocation2 + $0xe4] ss:$28 sps:$4 sm:$0xff]   ;;  %v5690_v17 = vld [vmem:[#allocation2 + $0xec] ss:$28 sps:$4 sm:$0xff]   ;;  %v5694_v20 = vld [vmem:[#allocation2 + $0x11c] ss:$28 sps:$4 sm:$0xff]  }
  0xa8   :  { %2685 = vmatprep.subr.bf16.mxu0 %v5676_v8  ;;  %2849 = vmatprep.subr.bf16.mxu1 %v5678_v9  ;;  %v5693_v19 = vld [vmem:[#allocation2 + $0xe8] ss:$28 sps:$4 sm:$0xff]   ;;  %v5698_v22 = vld [vmem:[#allocation2 + $0x118] ss:$28 sps:$4 sm:$0xff]   ;;  %v5699_v23 = vld [vmem:[#allocation2 + $0x120] ss:$28 sps:$4 sm:$0xff]  }
  0xa9   :  { %v5696_v21 = vld [vmem:[#allocation2 + $0x124] ss:$28 sps:$4 sm:$0xff]   ;;  %v5700_v24 = vld [vmem:[#allocation2 + $0x154] ss:$28 sps:$4 sm:$0xff]   ;;  %v5702_v25 = vld [vmem:[#allocation2 + $0x15c] ss:$28 sps:$4 sm:$0xff]  }
  0xaa   :  { %v5704_v26 = vld [vmem:[#allocation2 + $0x150] ss:$28 sps:$4 sm:$0xff]   ;;  %v5705_v27 = vld [vmem:[#allocation2 + $0x158] ss:$28 sps:$4 sm:$0xff]   ;;  %v5710_v30 = vld [vmem:[#allocation2 + $0x188] ss:$28 sps:$4 sm:$0xff]  }
  0xab   :  { %2686 = vmatpush1.bf16.msra.mxu0 %v5680_v10  ;;  %2850 = vmatpush1.bf16.msra.mxu1 %v5681_v11  ;;  %v5706_v28 = vld [vmem:[#allocation2 + $0x18c] ss:$28 sps:$4 sm:$0xff]   ;;  %v5708_v29 = vld [vmem:[#allocation2 + $0x194] ss:$28 sps:$4 sm:$0xff]   ;;  %v5712_v32 = vld [vmem:[#allocation2 + $0x1c4] ss:$28 sps:$4 sm:$0xff]  }
  0xac   :  { %2687 = vmatprep.subr.bf16.mxu0 %v5682_v12  ;;  %2851 = vmatprep.subr.bf16.mxu1 %v5684_v13  ;;  %v5711_v31 = vld [vmem:[#allocation2 + $0x190] ss:$28 sps:$4 sm:$0xff]   ;;  %v5716_v34 = vld [vmem:[#allocation2 + $0x1c0] ss:$28 sps:$4 sm:$0xff]   ;;  %v5717_v35 = vld [vmem:[#allocation2 + $0x1c8] ss:$28 sps:$4 sm:$0xff]  }
  0xad   :  { %v5714_v33 = vld [vmem:[#allocation2 + $0x1cc] ss:$28 sps:$4 sm:$0xff]   ;;  %v5718_v36 = vld [vmem:[#allocation2 + $0x1fc] ss:$28 sps:$4 sm:$0xff]   ;;  %v5720_v37 = vld [vmem:[#allocation2 + $0x204] ss:$28 sps:$4 sm:$0xff]  }
  0xae   :  { %v5722_v38 = vld [vmem:[#allocation2 + $0x1f8] ss:$28 sps:$4 sm:$0xff]   ;;  %v5723_v39 = vld [vmem:[#allocation2 + $0x200] ss:$28 sps:$4 sm:$0xff]   ;;  %v5728_v42 = vld [vmem:[#allocation2 + $0x230] ss:$28 sps:$4 sm:$0xff]  }
  0xaf   :  { %2688 = vmatpush1.bf16.msra.mxu0 %v5686_v14  ;;  %2852 = vmatpush1.bf16.msra.mxu1 %v5687_v15  ;;  %v5724_v40 = vld [vmem:[#allocation2 + $0x234] ss:$28 sps:$4 sm:$0xff]   ;;  %v5726_v41 = vld [vmem:[#allocation2 + $0x23c] ss:$28 sps:$4 sm:$0xff]   ;;  %v5730_v44 = vld [vmem:[#allocation2 + $0x26c] ss:$28 sps:$4 sm:$0xff]  }
  0xb0   :  { %2689 = vmatprep.subr.bf16.mxu0 %v5688_v16  ;;  %2853 = vmatprep.subr.bf16.mxu1 %v5690_v17  ;;  %v5729_v43 = vld [vmem:[#allocation2 + $0x238] ss:$28 sps:$4 sm:$0xff]   ;;  %v151_v46 = vld [vmem:[%s7078_s0] sm:$0xff]  ;;  %v5735_v49 = vld [vmem:[#allocation2 + $0x270] ss:$28 sps:$4 sm:$0xff]   ;;  %vm6735_vm0 = vmmov 0  }
  0xb1   :  { %v5732_v45 = vld [vmem:[#allocation2 + $0x274] ss:$28 sps:$4 sm:$0xff]   ;;  %v5734_v47 = vld [vmem:[#allocation2 + $0x268] ss:$28 sps:$4 sm:$0xff]   ;;  %v6923_v48 = vcombine.high %v151_v46, %v151_v46  ;;  %v5740_v52 = vld [vmem:[#allocation2 + $0x2a0] ss:$28 sps:$4 sm:$0xff]   ;;  %v6927_v5 = vcombine.low %v151_v46, %v151_v46 }
  0xb2   :  { %v5736_v50 = vld [vmem:[#allocation2 + $0x2a4] ss:$28 sps:$4 sm:$0xff]   ;;  %v5738_v51 = vld [vmem:[#allocation2 + $0x2ac] ss:$28 sps:$4 sm:$0xff]   ;;  %v5742_v54 = vld [vmem:[#allocation2 + $0x2dc] ss:$28 sps:$4 sm:$0xff]  }
  0xb3   :  { %2690 = vmatpush1.bf16.msra.mxu0 %v5692_v18  ;;  %2854 = vmatpush1.bf16.msra.mxu1 %v5693_v19  ;;  %v5741_v53 = vld [vmem:[#allocation2 + $0x2a8] ss:$28 sps:$4 sm:$0xff]   ;;  %v5746_v56 = vld [vmem:[#allocation2 + $0x2d8] ss:$28 sps:$4 sm:$0xff]   ;;  %v5747_v57 = vld [vmem:[#allocation2 + $0x2e0] ss:$28 sps:$4 sm:$0xff]  }
  0xb4   :  { %2691 = vmatprep.subr.bf16.mxu0 %v5694_v20  ;;  %2855 = vmatprep.subr.bf16.mxu1 %v5696_v21  ;;  %v5744_v55 = vld [vmem:[#allocation2 + $0x2e4] ss:$28 sps:$4 sm:$0xff]   ;;  %v5748_v58 = vld [vmem:[#allocation2 + $0x314] ss:$28 sps:$4 sm:$0xff]   ;;  %v5750_v59 = vld [vmem:[#allocation2 + $0x31c] ss:$28 sps:$4 sm:$0xff]  }
  0xb5   :  { %2713 = vmatprep.mubr.bf16.mxu0 %v6923_v48  ;;  %2877 = vmatprep.mubr.bf16.mxu1 %v6923_v48  ;;  %v5752_v60 = vld [vmem:[#allocation2 + $0x310] ss:$28 sps:$4 sm:$0xff]   ;;  %v5753_v61 = vld [vmem:[#allocation2 + $0x318] ss:$28 sps:$4 sm:$0xff]   ;;  %v5758_v0 = vld [vmem:[#allocation2 + $0x348] ss:$28 sps:$4 sm:$0xff]  }
  0xb6   :  { %v5754_v62 = vld [vmem:[#allocation2 + $0x34c] ss:$28 sps:$4 sm:$0xff]   ;;  %v5756_v63 = vld [vmem:[#allocation2 + $0x354] ss:$28 sps:$4 sm:$0xff]   ;;  %v5763_v2 = vld [vmem:[#allocation2 + $0x384] ss:$28 sps:$4 sm:$0xff]  }
  0xb7   :  { %2692 = vmatpush1.bf16.msra.mxu0 %v5698_v22  ;;  %2856 = vmatpush1.bf16.msra.mxu1 %v5699_v23  ;;  %v5759_v1 = vld [vmem:[#allocation2 + $0x350] ss:$28 sps:$4 sm:$0xff]   ;;  %v5761_v4 = vld [vmem:[#allocation2 + $0x380] ss:$28 sps:$4 sm:$0xff]   ;;  %v5764_v6 = vld [vmem:[#allocation2 + $0x388] ss:$28 sps:$4 sm:$0xff]  }
  0xb8   :  { %2693 = vmatprep.subr.bf16.mxu0 %v5700_v24  ;;  %2857 = vmatprep.subr.bf16.mxu1 %v5702_v25  ;;  %v5766_v3 = vld [vmem:[#allocation2 + $0x38c] ss:$28 sps:$4 sm:$0xff]   ;;  %v5770_v7 = vld [vmem:[#allocation2 + $0x3bc] ss:$28 sps:$4 sm:$0xff]   ;;  %v5773_v8 = vld [vmem:[#allocation2 + $0x3c4] ss:$28 sps:$4 sm:$0xff]  }
  0xb9   :  { %v5768_v9 = vld [vmem:[#allocation2 + $0x3b8] ss:$28 sps:$4 sm:$0xff]   ;;  %v5771_v10 = vld [vmem:[#allocation2 + $0x3c0] ss:$28 sps:$4 sm:$0xff]   ;;  %v5774_v13 = vld [vmem:[#allocation2 + $0x3f0] ss:$28 sps:$4 sm:$0xff]  }
  0xba   :  { %v5776_v11 = vld [vmem:[#allocation2 + $0x3f4] ss:$28 sps:$4 sm:$0xff]   ;;  %v5779_v12 = vld [vmem:[#allocation2 + $0x3fc] ss:$28 sps:$4 sm:$0xff]   ;;  %v5782_v15 = vld [vmem:[#allocation2 + $0x42c] ss:$28 sps:$4 sm:$0xff]  }
  0xbb   :  { %2694 = vmatpush1.bf16.msra.mxu0 %v5704_v26  ;;  %2858 = vmatpush1.bf16.msra.mxu1 %v5705_v27  ;;  %v5777_v14 = vld [vmem:[#allocation2 + $0x3f8] ss:$28 sps:$4 sm:$0xff]   ;;  %v5780_v17 = vld [vmem:[#allocation2 + $0x428] ss:$28 sps:$4 sm:$0xff]   ;;  %v5783_v18 = vld [vmem:[#allocation2 + $0x430] ss:$28 sps:$4 sm:$0xff]  }
  0xbc   :  { %2695 = vmatprep.subr.bf16.mxu0 %v5706_v28  ;;  %2859 = vmatprep.subr.bf16.mxu1 %v5708_v29  ;;  %v5785_v16 = vld [vmem:[#allocation2 + $0x434] ss:$28 sps:$4 sm:$0xff]   ;;  %v5788_v19 = vld [vmem:[#allocation2 + $0x464] ss:$28 sps:$4 sm:$0xff]   ;;  %v5791_v20 = vld [vmem:[#allocation2 + $0x46c] ss:$28 sps:$4 sm:$0xff]  }
  0xbd   :  { %v5786_v21 = vld [vmem:[#allocation2 + $0x460] ss:$28 sps:$4 sm:$0xff]   ;;  %v5789_v22 = vld [vmem:[#allocation2 + $0x468] ss:$28 sps:$4 sm:$0xff]   ;;  %v5792_v25 = vld [vmem:[#allocation2 + $0x498] ss:$28 sps:$4 sm:$0xff]  }
  0xbe   :  { %v5794_v23 = vld [vmem:[#allocation2 + $0x49c] ss:$28 sps:$4 sm:$0xff]   ;;  %v5797_v24 = vld [vmem:[#allocation2 + $0x4a4] ss:$28 sps:$4 sm:$0xff]   ;;  %v5800_v27 = vld [vmem:[#allocation2 + $0x4d4] ss:$28 sps:$4 sm:$0xff]  }
  0xbf   :  { %2696 = vmatpush1.bf16.msra.mxu0 %v5710_v30  ;;  %2860 = vmatpush1.bf16.msra.mxu1 %v5711_v31  ;;  %v5795_v26 = vld [vmem:[#allocation2 + $0x4a0] ss:$28 sps:$4 sm:$0xff]   ;;  %v6934_v29 = vld [vmem:[%s7078_s0 + $0x8] sm:$0xff]  ;;  %vm4872_vm1 = vcmask 15360  }
  0xc0   :  { %2697 = vmatprep.subr.bf16.mxu0 %v5712_v32  ;;  %2861 = vmatprep.subr.bf16.mxu1 %v5714_v33  ;;  %v5803_v28 = vld [vmem:[#allocation2 + $0x4dc] ss:$28 sps:$4 sm:$0xff]   ;;  %v6938_v30 = vcombine.high %v6934_v29, %v6934_v29  ;;  %v5798_v31 = vld [vmem:[#allocation2 + $0x4d0] ss:$28 sps:$4 sm:$0xff]  }
  0xc1   :  { %v5801_v32 = vld [vmem:[#allocation2 + $0x4d8] ss:$28 sps:$4 sm:$0xff]   ;;  %v5806_v33 = vld [vmem:[#allocation2 + $0x50c] ss:$28 sps:$4 sm:$0xff]  }
  0xc2   :  { %v5827_v46 = vld [vmem:[#allocation2 + $0x5bc] ss:$28 sps:$4 sm:$0xff]  }
  0xc3   :  { %2698 = vmatpush1.bf16.msra.mxu0 %v5716_v34  ;;  %2862 = vmatpush1.bf16.msra.mxu1 %v5717_v35  ;;  %v5809_v34 = vld [vmem:[#allocation2 + $0x514] ss:$28 sps:$4 sm:$0xff]   ;;  %v5804_v35 = vld [vmem:[#allocation2 + $0x508] ss:$28 sps:$4 sm:$0xff]  }
  0xc4   :  { %2699 = vmatprep.subr.bf16.mxu0 %v5718_v36  ;;  %2863 = vmatprep.subr.bf16.mxu1 %v5720_v37  ;;  %v5807_v36 = vld [vmem:[#allocation2 + $0x510] ss:$28 sps:$4 sm:$0xff]   ;;  %v5812_v37 = vld [vmem:[#allocation2 + $0x544] ss:$28 sps:$4 sm:$0xff]  }
  0xc7   :  { %2700 = vmatpush1.bf16.msra.mxu0 %v5722_v38  ;;  %2864 = vmatpush1.bf16.msra.mxu1 %v5723_v39  ;;  %v5815_v38 = vld [vmem:[#allocation2 + $0x54c] ss:$28 sps:$4 sm:$0xff]   ;;  %v5810_v39 = vld [vmem:[#allocation2 + $0x540] ss:$28 sps:$4 sm:$0xff]  }
  0xc8   :  { %2701 = vmatprep.subr.bf16.mxu0 %v5724_v40  ;;  %2865 = vmatprep.subr.bf16.mxu1 %v5726_v41  ;;  %v5813_v40 = vld [vmem:[#allocation2 + $0x548] ss:$28 sps:$4 sm:$0xff]   ;;  %v5818_v41 = vld [vmem:[#allocation2 + $0x57c] ss:$28 sps:$4 sm:$0xff]  }
  0xcb   :  { %2702 = vmatpush1.bf16.msra.mxu0 %v5728_v42  ;;  %2866 = vmatpush1.bf16.msra.mxu1 %v5729_v43  ;;  %v5821_v42 = vld [vmem:[#allocation2 + $0x584] ss:$28 sps:$4 sm:$0xff]   ;;  %v5816_v43 = vld [vmem:[#allocation2 + $0x578] ss:$28 sps:$4 sm:$0xff]  }
  0xcc   :  { %2703 = vmatprep.subr.bf16.mxu0 %v5730_v44  ;;  %2867 = vmatprep.subr.bf16.mxu1 %v5732_v45  ;;  %v5819_v44 = vld [vmem:[#allocation2 + $0x580] ss:$28 sps:$4 sm:$0xff]   ;;  %v5824_v45 = vld [vmem:[#allocation2 + $0x5b4] ss:$28 sps:$4 sm:$0xff]  }
  0xcf   :  { %2704 = vmatpush1.bf16.msra.mxu0 %v5734_v47  ;;  %2868 = vmatpush1.bf16.msra.mxu1 %v5735_v49  ;;  %v5822_v47 = vld [vmem:[#allocation2 + $0x5b0] ss:$28 sps:$4 sm:$0xff]   ;;  %v5825_v49 = vld [vmem:[#allocation2 + $0x5b8] ss:$28 sps:$4 sm:$0xff]  }
  0xd0   :  { %2705 = vmatprep.subr.bf16.mxu0 %v5736_v50  ;;  %2869 = vmatprep.subr.bf16.mxu1 %v5738_v51  ;;  %v5830_v50 = vld [vmem:[#allocation2 + $0x5ec] ss:$28 sps:$4 sm:$0xff]   ;;  %v5833_v51 = vld [vmem:[#allocation2 + $0x5f4] ss:$28 sps:$4 sm:$0xff]  }
  0xd3   :  { %2706 = vmatpush1.bf16.msra.mxu0 %v5740_v52  ;;  %2870 = vmatpush1.bf16.msra.mxu1 %v5741_v53  ;;  %v5828_v52 = vld [vmem:[#allocation2 + $0x5e8] ss:$28 sps:$4 sm:$0xff]   ;;  %v5831_v53 = vld [vmem:[#allocation2 + $0x5f0] ss:$28 sps:$4 sm:$0xff]  }
  0xd4   :  { %2707 = vmatprep.subr.bf16.mxu0 %v5742_v54  ;;  %2871 = vmatprep.subr.bf16.mxu1 %v5744_v55  ;;  %v5836_v54 = vld [vmem:[#allocation2 + $0x624] ss:$28 sps:$4 sm:$0xff]   ;;  %v5839_v55 = vld [vmem:[#allocation2 + $0x62c] ss:$28 sps:$4 sm:$0xff]  }
  0xd7   :  { %2708 = vmatpush1.bf16.msra.mxu0 %v5746_v56  ;;  %2872 = vmatpush1.bf16.msra.mxu1 %v5747_v57  ;;  %v5834_v56 = vld [vmem:[#allocation2 + $0x620] ss:$28 sps:$4 sm:$0xff]   ;;  %v5837_v57 = vld [vmem:[#allocation2 + $0x628] ss:$28 sps:$4 sm:$0xff]  }
  0xd8   :  { %2709 = vmatprep.subr.bf16.mxu0 %v5748_v58  ;;  %2873 = vmatprep.subr.bf16.mxu1 %v5750_v59  ;;  %v5842_v58 = vld [vmem:[#allocation2 + $0x65c] ss:$28 sps:$4 sm:$0xff]   ;;  %v5845_v59 = vld [vmem:[#allocation2 + $0x664] ss:$28 sps:$4 sm:$0xff]  }
  0xdb   :  { %2710 = vmatpush1.bf16.msra.mxu0 %v5752_v60  ;;  %2874 = vmatpush1.bf16.msra.mxu1 %v5753_v61  ;;  %v5840_v60 = vld [vmem:[#allocation2 + $0x658] ss:$28 sps:$4 sm:$0xff]   ;;  %v5843_v61 = vld [vmem:[#allocation2 + $0x660] ss:$28 sps:$4 sm:$0xff]  }
  0xdc   :  { %2711 = vmatprep.subr.bf16.mxu0 %v5754_v62  ;;  %2875 = vmatprep.subr.bf16.mxu1 %v5756_v63  ;;  %v5848_v62 = vld [vmem:[#allocation2 + $0x694] ss:$28 sps:$4 sm:$0xff]   ;;  %v5851_v63 = vld [vmem:[#allocation2 + $0x69c] ss:$28 sps:$4 sm:$0xff]  }
  0xdf   :  { %2712 = vmatpush1.bf16.msra.mxu0 %v5758_v0  ;;  %2876 = vmatpush1.bf16.msra.mxu1 %v5759_v1  ;;  %v5846_v0 = vld [vmem:[#allocation2 + $0x690] ss:$28 sps:$4 sm:$0xff]   ;;  %v5849_v1 = vld [vmem:[#allocation2 + $0x698] ss:$28 sps:$4 sm:$0xff]  }
  0xe0   :  { %2722 = vmatprep.subr.bf16.mxu0 %v5763_v2  ;;  %2886 = vmatprep.subr.bf16.mxu1 %v5766_v3  ;;  %v5854_v2 = vld [vmem:[#allocation2 + $0x6cc] ss:$28 sps:$4 sm:$0xff]   ;;  %v5857_v3 = vld [vmem:[#allocation2 + $0x6d4] ss:$28 sps:$4 sm:$0xff]  }
  0xe2   :  { %2714 = vmatmul.mubr.bf16.vlgmr.msra.gmra.mrb[0].mxu0 %v6927_v5  ;;  %2878 = vmatmul.mubr.bf16.vlgmr.msra.gmra.mrb[0].mxu1 %v6927_v5 }
  0xe3   :  { %2723 = vmatpush1.bf16.msra.mxu0 %v5761_v4  ;;  %2887 = vmatpush1.bf16.msra.mxu1 %v5764_v6  ;;  %v5852_v4 = vld [vmem:[#allocation2 + $0x6c8] ss:$28 sps:$4 sm:$0xff]   ;;  %v5855_v6 = vld [vmem:[#allocation2 + $0x6d0] ss:$28 sps:$4 sm:$0xff]  }
  0xe4   :  { %2724 = vmatprep.subr.bf16.mxu0 %v5770_v7  ;;  %2888 = vmatprep.subr.bf16.mxu1 %v5773_v8  ;;  %v5861_v7 = vld [vmem:[#allocation2 + $0x704] ss:$28 sps:$4 sm:$0xff]   ;;  %v5864_v8 = vld [vmem:[#allocation2 + $0x70c] ss:$28 sps:$4 sm:$0xff]  }
  0xe5   :  { %2754 = vmatprep.mubr.bf16.mxu0 %v6938_v30  ;;  %2918 = vmatprep.mubr.bf16.mxu1 %v6938_v30 }
  0xe7   :  { %2725 = vmatpush1.bf16.msra.mxu0 %v5768_v9  ;;  %2889 = vmatpush1.bf16.msra.mxu1 %v5771_v10  ;;  %v5859_v9 = vld [vmem:[#allocation2 + $0x700] ss:$28 sps:$4 sm:$0xff]   ;;  %v6944_v10 = vcombine.low %v6934_v29, %v6934_v29  ;;  %v5887_v29 = vld [vmem:[#allocation2 + $0x7e8] ss:$28 sps:$4 sm:$0xff]  }
  0xe8   :  { %2726 = vmatprep.subr.bf16.mxu0 %v5776_v11  ;;  %2890 = vmatprep.subr.bf16.mxu1 %v5779_v12  ;;  %v5862_v11 = vld [vmem:[#allocation2 + $0x708] ss:$28 sps:$4 sm:$0xff]   ;;  %v5868_v12 = vld [vmem:[#allocation2 + $0x73c] ss:$28 sps:$4 sm:$0xff]  }
  0xeb   :  { %2727 = vmatpush1.bf16.msra.mxu0 %v5774_v13  ;;  %2891 = vmatpush1.bf16.msra.mxu1 %v5777_v14  ;;  %v6949_v13 = vld [vmem:[%s7078_s0 + $0x10] sm:$0xff]  ;;  %v5871_v14 = vld [vmem:[#allocation2 + $0x744] ss:$28 sps:$4 sm:$0xff]  }
  0xec   :  { %2728 = vmatprep.subr.bf16.mxu0 %v5782_v15  ;;  %2892 = vmatprep.subr.bf16.mxu1 %v5785_v16  ;;  %v6953_v15 = vcombine.high %v6949_v13, %v6949_v13  ;;  %v5866_v16 = vld [vmem:[#allocation2 + $0x738] ss:$28 sps:$4 sm:$0xff]  }
  0xef   :  { %2729 = vmatpush1.bf16.msra.mxu0 %v5780_v17  ;;  %2893 = vmatpush1.bf16.msra.mxu1 %v5783_v18  ;;  %v5869_v17 = vld [vmem:[#allocation2 + $0x740] ss:$28 sps:$4 sm:$0xff]   ;;  %v5874_v18 = vld [vmem:[#allocation2 + $0x774] ss:$28 sps:$4 sm:$0xff]  }
  0xf0   :  { %2730 = vmatprep.subr.bf16.mxu0 %v5788_v19  ;;  %2894 = vmatprep.subr.bf16.mxu1 %v5791_v20  ;;  %v5877_v19 = vld [vmem:[#allocation2 + $0x77c] ss:$28 sps:$4 sm:$0xff]   ;;  %v5872_v20 = vld [vmem:[#allocation2 + $0x770] ss:$28 sps:$4 sm:$0xff]  }
  0xf3   :  { %2731 = vmatpush1.bf16.msra.mxu0 %v5786_v21  ;;  %2895 = vmatpush1.bf16.msra.mxu1 %v5789_v22  ;;  %v5875_v21 = vld [vmem:[#allocation2 + $0x778] ss:$28 sps:$4 sm:$0xff]   ;;  %v5880_v22 = vld [vmem:[#allocation2 + $0x7ac] ss:$28 sps:$4 sm:$0xff]  }
  0xf4   :  { %2732 = vmatprep.subr.bf16.mxu0 %v5794_v23  ;;  %2896 = vmatprep.subr.bf16.mxu1 %v5797_v24  ;;  %v5883_v23 = vld [vmem:[#allocation2 + $0x7b4] ss:$28 sps:$4 sm:$0xff]   ;;  %v5878_v24 = vld [vmem:[#allocation2 + $0x7a8] ss:$28 sps:$4 sm:$0xff]  }
  0xf7   :  { %2733 = vmatpush1.bf16.msra.mxu0 %v5792_v25  ;;  %2897 = vmatpush1.bf16.msra.mxu1 %v5795_v26  ;;  %v5881_v25 = vld [vmem:[#allocation2 + $0x7b0] ss:$28 sps:$4 sm:$0xff]   ;;  %v5886_v26 = vld [vmem:[#allocation2 + $0x7e4] ss:$28 sps:$4 sm:$0xff]  }
  0xf8   :  { %2734 = vmatprep.subr.bf16.mxu0 %v5800_v27  ;;  %2898 = vmatprep.subr.bf16.mxu1 %v5803_v28  ;;  %v5889_v27 = vld [vmem:[#allocation2 + $0x7ec] ss:$28 sps:$4 sm:$0xff]   ;;  %v5884_v28 = vld [vmem:[#allocation2 + $0x7e0] ss:$28 sps:$4 sm:$0xff]  }
  0xfb   :  { %2735 = vmatpush1.bf16.msra.mxu0 %v5798_v31  ;;  %2899 = vmatpush1.bf16.msra.mxu1 %v5801_v32  ;;  %v5892_v31 = vld [vmem:[#allocation2 + $0x81c] ss:$28 sps:$4 sm:$0xff]   ;;  %v5895_v32 = vld [vmem:[#allocation2 + $0x824] ss:$28 sps:$4 sm:$0xff]  }
  0xfc   :  { %2736 = vmatprep.subr.bf16.mxu0 %v5806_v33  ;;  %2900 = vmatprep.subr.bf16.mxu1 %v5809_v34  ;;  %v5890_v33 = vld [vmem:[#allocation2 + $0x818] ss:$28 sps:$4 sm:$0xff]   ;;  %v5893_v34 = vld [vmem:[#allocation2 + $0x820] ss:$28 sps:$4 sm:$0xff]  }
  0xff   :  { %2737 = vmatpush1.bf16.msra.mxu0 %v5804_v35  ;;  %2901 = vmatpush1.bf16.msra.mxu1 %v5807_v36  ;;  %v5898_v35 = vld [vmem:[#allocation2 + $0x854] ss:$28 sps:$4 sm:$0xff]   ;;  %v5901_v36 = vld [vmem:[#allocation2 + $0x85c] ss:$28 sps:$4 sm:$0xff]  }
 0x100   :  { %2738 = vmatprep.subr.bf16.mxu0 %v5812_v37  ;;  %2902 = vmatprep.subr.bf16.mxu1 %v5815_v38  ;;  %v5896_v37 = vld [vmem:[#allocation2 + $0x850] ss:$28 sps:$4 sm:$0xff]   ;;  %v5899_v38 = vld [vmem:[#allocation2 + $0x858] ss:$28 sps:$4 sm:$0xff]  }
 0x103   :  { %2739 = vmatpush1.bf16.msra.mxu0 %v5810_v39  ;;  %2903 = vmatpush1.bf16.msra.mxu1 %v5813_v40  ;;  %v5904_v39 = vld [vmem:[#allocation2 + $0x88c] ss:$28 sps:$4 sm:$0xff]   ;;  %v5907_v40 = vld [vmem:[#allocation2 + $0x894] ss:$28 sps:$4 sm:$0xff]  }
 0x104   :  { %2740 = vmatprep.subr.bf16.mxu0 %v5818_v41  ;;  %2904 = vmatprep.subr.bf16.mxu1 %v5821_v42  ;;  %v5902_v41 = vld [vmem:[#allocation2 + $0x888] ss:$28 sps:$4 sm:$0xff]   ;;  %v5905_v42 = vld [vmem:[#allocation2 + $0x890] ss:$28 sps:$4 sm:$0xff]  }
 0x107   :  { %2741 = vmatpush1.bf16.msra.mxu0 %v5816_v43  ;;  %2905 = vmatpush1.bf16.msra.mxu1 %v5819_v44  ;;  %v5910_v43 = vld [vmem:[#allocation2 + $0x8c4] ss:$28 sps:$4 sm:$0xff]   ;;  %v5913_v44 = vld [vmem:[#allocation2 + $0x8cc] ss:$28 sps:$4 sm:$0xff]  }
 0x108   :  { %2742 = vmatprep.subr.bf16.mxu0 %v5824_v45  ;;  %2906 = vmatprep.subr.bf16.mxu1 %v5827_v46  ;;  %v5908_v45 = vld [vmem:[#allocation2 + $0x8c0] ss:$28 sps:$4 sm:$0xff]   ;;  %v5911_v46 = vld [vmem:[#allocation2 + $0x8c8] ss:$28 sps:$4 sm:$0xff]  }
 0x10b   :  { %2743 = vmatpush1.bf16.msra.mxu0 %v5822_v47  ;;  %2907 = vmatpush1.bf16.msra.mxu1 %v5825_v49  ;;  %v5916_v47 = vld [vmem:[#allocation2 + $0x8fc] ss:$28 sps:$4 sm:$0xff]   ;;  %v5919_v49 = vld [vmem:[#allocation2 + $0x904] ss:$28 sps:$4 sm:$0xff]  }
 0x10c   :  { %2744 = vmatprep.subr.bf16.mxu0 %v5830_v50  ;;  %2908 = vmatprep.subr.bf16.mxu1 %v5833_v51  ;;  %v5914_v50 = vld [vmem:[#allocation2 + $0x8f8] ss:$28 sps:$4 sm:$0xff]   ;;  %v5917_v51 = vld [vmem:[#allocation2 + $0x900] ss:$28 sps:$4 sm:$0xff]  }
 0x10f   :  { %2745 = vmatpush1.bf16.msra.mxu0 %v5828_v52  ;;  %2909 = vmatpush1.bf16.msra.mxu1 %v5831_v53  ;;  %v5922_v52 = vld [vmem:[#allocation2 + $0x934] ss:$28 sps:$4 sm:$0xff]   ;;  %v5925_v53 = vld [vmem:[#allocation2 + $0x93c] ss:$28 sps:$4 sm:$0xff]  }
 0x110   :  { %2746 = vmatprep.subr.bf16.mxu0 %v5836_v54  ;;  %2910 = vmatprep.subr.bf16.mxu1 %v5839_v55  ;;  %v5920_v54 = vld [vmem:[#allocation2 + $0x930] ss:$28 sps:$4 sm:$0xff]   ;;  %v5923_v55 = vld [vmem:[#allocation2 + $0x938] ss:$28 sps:$4 sm:$0xff]  }
 0x113   :  { %2747 = vmatpush1.bf16.msra.mxu0 %v5834_v56  ;;  %2911 = vmatpush1.bf16.msra.mxu1 %v5837_v57  ;;  %v5928_v56 = vld [vmem:[#allocation2 + $0x96c] ss:$28 sps:$4 sm:$0xff]   ;;  %v5931_v57 = vld [vmem:[#allocation2 + $0x974] ss:$28 sps:$4 sm:$0xff]  }
 0x114   :  { %2748 = vmatprep.subr.bf16.mxu0 %v5842_v58  ;;  %2912 = vmatprep.subr.bf16.mxu1 %v5845_v59  ;;  %v5926_v58 = vld [vmem:[#allocation2 + $0x968] ss:$28 sps:$4 sm:$0xff]   ;;  %v5929_v59 = vld [vmem:[#allocation2 + $0x970] ss:$28 sps:$4 sm:$0xff]  }
 0x117   :  { %2749 = vmatpush1.bf16.msra.mxu0 %v5840_v60  ;;  %2913 = vmatpush1.bf16.msra.mxu1 %v5843_v61  ;;  %v5934_v60 = vld [vmem:[#allocation2 + $0x9a4] ss:$28 sps:$4 sm:$0xff]   ;;  %v5937_v61 = vld [vmem:[#allocation2 + $0x9ac] ss:$28 sps:$4 sm:$0xff]  }
 0x118   :  { %2750 = vmatprep.subr.bf16.mxu0 %v5848_v62  ;;  %2914 = vmatprep.subr.bf16.mxu1 %v5851_v63  ;;  %v5932_v62 = vld [vmem:[#allocation2 + $0x9a0] ss:$28 sps:$4 sm:$0xff]   ;;  %v5935_v63 = vld [vmem:[#allocation2 + $0x9a8] ss:$28 sps:$4 sm:$0xff]  }
 0x11b   :  { %2751 = vmatpush1.bf16.msra.mxu0 %v5846_v0  ;;  %2915 = vmatpush1.bf16.msra.mxu1 %v5849_v1  ;;  %v5940_v0 = vld [vmem:[#allocation2 + $0x9dc] ss:$28 sps:$4 sm:$0xff]   ;;  %v5943_v1 = vld [vmem:[#allocation2 + $0x9e4] ss:$28 sps:$4 sm:$0xff]  }
 0x11c   :  { %2752 = vmatprep.subr.bf16.mxu0 %v5854_v2  ;;  %2916 = vmatprep.subr.bf16.mxu1 %v5857_v3  ;;  %v5938_v2 = vld [vmem:[#allocation2 + $0x9d8] ss:$28 sps:$4 sm:$0xff]   ;;  %v5941_v3 = vld [vmem:[#allocation2 + $0x9e0] ss:$28 sps:$4 sm:$0xff]  }
 0x11f   :  { %2753 = vmatpush1.bf16.msra.mxu0 %v5852_v4  ;;  %2917 = vmatpush1.bf16.msra.mxu1 %v5855_v6  ;;  %v5946_v4 = vld [vmem:[#allocation2 + $0xa14] ss:$28 sps:$4 sm:$0xff]   ;;  %v5949_v6 = vld [vmem:[#allocation2 + $0xa1c] ss:$28 sps:$4 sm:$0xff]  }
 0x120   :  { %2763 = vmatprep.subr.bf16.mxu0 %v5861_v7  ;;  %2927 = vmatprep.subr.bf16.mxu1 %v5864_v8  ;;  %v5944_v7 = vld [vmem:[#allocation2 + $0xa10] ss:$28 sps:$4 sm:$0xff]   ;;  %v5947_v8 = vld [vmem:[#allocation2 + $0xa18] ss:$28 sps:$4 sm:$0xff]  }
 0x122   :  { %2755 = vmatmul.mubr.bf16.vlgmr.msra.gmra.mrb[0].mxu0 %v6944_v10  ;;  %2919 = vmatmul.mubr.bf16.vlgmr.msra.gmra.mrb[0].mxu1 %v6944_v10 }
 0x123   :  { %2764 = vmatpush1.bf16.msra.mxu0 %v5859_v9  ;;  %2928 = vmatpush1.bf16.msra.mxu1 %v5862_v11  ;;  %v5952_v9 = vld [vmem:[#allocation2 + $0xa4c] ss:$28 sps:$4 sm:$0xff]   ;;  %v5955_v11 = vld [vmem:[#allocation2 + $0xa54] ss:$28 sps:$4 sm:$0xff]  }
 0x124   :  { %2765 = vmatprep.subr.bf16.mxu0 %v5868_v12  ;;  %2929 = vmatprep.subr.bf16.mxu1 %v5871_v14  ;;  %v5950_v12 = vld [vmem:[#allocation2 + $0xa48] ss:$28 sps:$4 sm:$0xff]   ;;  %v5953_v14 = vld [vmem:[#allocation2 + $0xa50] ss:$28 sps:$4 sm:$0xff]  }
 0x125   :  { %2795 = vmatprep.mubr.bf16.mxu0 %v6953_v15  ;;  %2959 = vmatprep.mubr.bf16.mxu1 %v6953_v15 }
 0x127   :  { %2766 = vmatpush1.bf16.msra.mxu0 %v5866_v16  ;;  %2930 = vmatpush1.bf16.msra.mxu1 %v5869_v17  ;;  %v5959_v16 = vld [vmem:[#allocation2 + $0xa84] ss:$28 sps:$4 sm:$0xff]   ;;  %v5962_v17 = vld [vmem:[#allocation2 + $0xa8c] ss:$28 sps:$4 sm:$0xff]  }
 0x128   :  { %2767 = vmatprep.subr.bf16.mxu0 %v5874_v18  ;;  %2931 = vmatprep.subr.bf16.mxu1 %v5877_v19  ;;  %v5957_v18 = vld [vmem:[#allocation2 + $0xa80] ss:$28 sps:$4 sm:$0xff]   ;;  %v6961_v19 = vcombine.low %v6949_v13, %v6949_v13 }
 0x129   :  { %v5975_v13 = vld [vmem:[#allocation2 + $0xafc] ss:$28 sps:$4 sm:$0xff]  }
 0x12b   :  { %2768 = vmatpush1.bf16.msra.mxu0 %v5872_v20  ;;  %2932 = vmatpush1.bf16.msra.mxu1 %v5875_v21  ;;  %v5960_v20 = vld [vmem:[#allocation2 + $0xa88] ss:$28 sps:$4 sm:$0xff]   ;;  %v5966_v21 = vld [vmem:[#allocation2 + $0xabc] ss:$28 sps:$4 sm:$0xff]  }
 0x12c   :  { %2769 = vmatprep.subr.bf16.mxu0 %v5880_v22  ;;  %2933 = vmatprep.subr.bf16.mxu1 %v5883_v23  ;;  %v5969_v22 = vld [vmem:[#allocation2 + $0xac4] ss:$28 sps:$4 sm:$0xff]   ;;  %v5964_v23 = vld [vmem:[#allocation2 + $0xab8] ss:$28 sps:$4 sm:$0xff]  }
 0x12f   :  { %2770 = vmatpush1.bf16.msra.mxu0 %v5878_v24  ;;  %2934 = vmatpush1.bf16.msra.mxu1 %v5881_v25  ;;  %v5967_v24 = vld [vmem:[#allocation2 + $0xac0] ss:$28 sps:$4 sm:$0xff]   ;;  %v5972_v25 = vld [vmem:[#allocation2 + $0xaf4] ss:$28 sps:$4 sm:$0xff]  }
 0x130   :  { %2771 = vmatprep.subr.bf16.mxu0 %v5886_v26  ;;  %2935 = vmatprep.subr.bf16.mxu1 %v5889_v27  ;;  %v5970_v26 = vld [vmem:[#allocation2 + $0xaf0] ss:$28 sps:$4 sm:$0xff]   ;;  %v6733_v27 = vmov 0  }
 0x133   :  { %2772 = vmatpush1.bf16.msra.mxu0 %v5884_v28  ;;  %2936 = vmatpush1.bf16.msra.mxu1 %v5887_v29  ;;  %v5973_v28 = vld [vmem:[#allocation2 + $0xaf8] ss:$28 sps:$4 sm:$0xff]   ;;  %v5978_v29 = vld [vmem:[#allocation2 + $0xb2c] ss:$28 sps:$4 sm:$0xff]  }
 0x134   :  { %2773 = vmatprep.subr.bf16.mxu0 %v5892_v31  ;;  %2937 = vmatprep.subr.bf16.mxu1 %v5895_v32  ;;  %v5981_v31 = vld [vmem:[#allocation2 + $0xb34] ss:$28 sps:$4 sm:$0xff]   ;;  %v5976_v32 = vld [vmem:[#allocation2 + $0xb28] ss:$28 sps:$4 sm:$0xff]  }
 0x137   :  { %2774 = vmatpush1.bf16.msra.mxu0 %v5890_v33  ;;  %2938 = vmatpush1.bf16.msra.mxu1 %v5893_v34  ;;  %v5979_v33 = vld [vmem:[#allocation2 + $0xb30] ss:$28 sps:$4 sm:$0xff]   ;;  %v5984_v34 = vld [vmem:[#allocation2 + $0xb64] ss:$28 sps:$4 sm:$0xff]  }
 0x138   :  { %2775 = vmatprep.subr.bf16.mxu0 %v5898_v35  ;;  %2939 = vmatprep.subr.bf16.mxu1 %v5901_v36  ;;  %v5987_v35 = vld [vmem:[#allocation2 + $0xb6c] ss:$28 sps:$4 sm:$0xff]   ;;  %v5982_v36 = vld [vmem:[#allocation2 + $0xb60] ss:$28 sps:$4 sm:$0xff]  }
 0x13b   :  { %2776 = vmatpush1.bf16.msra.mxu0 %v5896_v37  ;;  %2940 = vmatpush1.bf16.msra.mxu1 %v5899_v38  ;;  %v5985_v37 = vld [vmem:[#allocation2 + $0xb68] ss:$28 sps:$4 sm:$0xff]   ;;  %v5990_v38 = vld [vmem:[#allocation2 + $0xb9c] ss:$28 sps:$4 sm:$0xff]  }
 0x13c   :  { %2777 = vmatprep.subr.bf16.mxu0 %v5904_v39  ;;  %2941 = vmatprep.subr.bf16.mxu1 %v5907_v40  ;;  %v5993_v39 = vld [vmem:[#allocation2 + $0xba4] ss:$28 sps:$4 sm:$0xff]   ;;  %v5988_v40 = vld [vmem:[#allocation2 + $0xb98] ss:$28 sps:$4 sm:$0xff]  }
 0x13f   :  { %2778 = vmatpush1.bf16.msra.mxu0 %v5902_v41  ;;  %2942 = vmatpush1.bf16.msra.mxu1 %v5905_v42  ;;  %v5991_v41 = vld [vmem:[#allocation2 + $0xba0] ss:$28 sps:$4 sm:$0xff]   ;;  %v5996_v42 = vld [vmem:[#allocation2 + $0xbd4] ss:$28 sps:$4 sm:$0xff]  }
 0x140   :  { %2779 = vmatprep.subr.bf16.mxu0 %v5910_v43  ;;  %2943 = vmatprep.subr.bf16.mxu1 %v5913_v44  ;;  %v5999_v43 = vld [vmem:[#allocation2 + $0xbdc] ss:$28 sps:$4 sm:$0xff]   ;;  %v5994_v44 = vld [vmem:[#allocation2 + $0xbd0] ss:$28 sps:$4 sm:$0xff]  }
 0x143   :  { %2780 = vmatpush1.bf16.msra.mxu0 %v5908_v45  ;;  %2944 = vmatpush1.bf16.msra.mxu1 %v5911_v46  ;;  %v5997_v45 = vld [vmem:[#allocation2 + $0xbd8] ss:$28 sps:$4 sm:$0xff]   ;;  %v6002_v46 = vld [vmem:[#allocation2 + $0xc0c] ss:$28 sps:$4 sm:$0xff]  }
 0x144   :  { %2781 = vmatprep.subr.bf16.mxu0 %v5916_v47  ;;  %2945 = vmatprep.subr.bf16.mxu1 %v5919_v49  ;;  %v6005_v47 = vld [vmem:[#allocation2 + $0xc14] ss:$28 sps:$4 sm:$0xff]   ;;  %v6000_v49 = vld [vmem:[#allocation2 + $0xc08] ss:$28 sps:$4 sm:$0xff]  }
 0x147   :  { %2782 = vmatpush1.bf16.msra.mxu0 %v5914_v50  ;;  %2946 = vmatpush1.bf16.msra.mxu1 %v5917_v51  ;;  %v6003_v50 = vld [vmem:[#allocation2 + $0xc10] ss:$28 sps:$4 sm:$0xff]  }
 0x148   :  { %2783 = vmatprep.subr.bf16.mxu0 %v5922_v52  ;;  %2947 = vmatprep.subr.bf16.mxu1 %v5925_v53  ;;  %v6009_v51 = vld [vmem:[#allocation2 + $0x14] ss:$28 sps:$4 sm:$0xff]   ;;  %v6006_v53 = vld [vmem:[%s7078_s0 + $0x18] ss:$0 sps:$4 sm:$0xff]  }
 0x149   :  { %v6028_v52 = vld [vmem:[#allocation2 + $0x1d8] ss:$28 sps:$4 sm:$0xff]  }
 0x14b   :  { %2784 = vmatpush1.bf16.msra.mxu0 %v5920_v54  ;;  %2948 = vmatpush1.bf16.msra.mxu1 %v5923_v55  ;;  %v6007_v54 = vld [vmem:[#allocation2 + $0x10] ss:$28 sps:$4 sm:$0xff]   ;;  %v6032_v55 = vld [vmem:[#allocation2 + $0x18] ss:$28 sps:$4 sm:$0xff]  }
 0x14c   :  { %2785 = vmatprep.subr.bf16.mxu0 %v5928_v56  ;;  %2949 = vmatprep.subr.bf16.mxu1 %v5931_v57  ;;  %v6012_v56 = vld [vmem:[#allocation2 + $0x4c] ss:$28 sps:$4 sm:$0xff]  }
 0x14d   :  { %v6033_v57 = vld [vmem:[#allocation2 + $0x210] ss:$28 sps:$4 sm:$0xff]  }
 0x14f   :  { %2786 = vmatpush1.bf16.msra.mxu0 %v5926_v58  ;;  %2950 = vmatpush1.bf16.msra.mxu1 %v5929_v59  ;;  %v6010_v58 = vld [vmem:[#allocation2 + $0x48] ss:$28 sps:$4 sm:$0xff]  }
 0x150   :  { %2787 = vmatprep.subr.bf16.mxu0 %v5934_v60  ;;  %2951 = vmatprep.subr.bf16.mxu1 %v5937_v61  ;;  %v6015_v59 = vld [vmem:[#allocation2 + $0x84] ss:$28 sps:$4 sm:$0xff]   ;;  %v6037_v60 = vld [vmem:[#allocation2 + $0x50] ss:$28 sps:$4 sm:$0xff]  }
 0x151   :  { %v6038_v61 = vld [vmem:[#allocation2 + $0x248] ss:$28 sps:$4 sm:$0xff]  }
 0x153   :  { %2788 = vmatpush1.bf16.msra.mxu0 %v5932_v62  ;;  %2952 = vmatpush1.bf16.msra.mxu1 %v5935_v63  ;;  %v6013_v62 = vld [vmem:[#allocation2 + $0x80] ss:$28 sps:$4 sm:$0xff]  }
 0x154   :  { %2789 = vmatprep.subr.bf16.mxu0 %v5940_v0  ;;  %2953 = vmatprep.subr.bf16.mxu1 %v5943_v1  ;;  %v6018_v63 = vld [vmem:[#allocation2 + $0xbc] ss:$28 sps:$4 sm:$0xff]   ;;  %v6042_v0 = vld [vmem:[#allocation2 + $0x88] ss:$28 sps:$4 sm:$0xff]  }
 0x155   :  { %v6043_v1 = vld [vmem:[#allocation2 + $0x280] ss:$28 sps:$4 sm:$0xff]  }
 0x157   :  { %2790 = vmatpush1.bf16.msra.mxu0 %v5938_v2  ;;  %2954 = vmatpush1.bf16.msra.mxu1 %v5941_v3  ;;  %v6016_v2 = vld [vmem:[#allocation2 + $0xb8] ss:$28 sps:$4 sm:$0xff]  }
 0x158   :  { %2791 = vmatprep.subr.bf16.mxu0 %v5946_v4  ;;  %2955 = vmatprep.subr.bf16.mxu1 %v5949_v6  ;;  %v6021_v3 = vld [vmem:[#allocation2 + $0xf4] ss:$28 sps:$4 sm:$0xff]   ;;  %v6047_v4 = vld [vmem:[#allocation2 + $0xc0] ss:$28 sps:$4 sm:$0xff]  }
 0x159   :  { %v6048_v6 = vld [vmem:[#allocation2 + $0x2b8] ss:$28 sps:$4 sm:$0xff]  }
 0x15b   :  { %2792 = vmatpush1.bf16.msra.mxu0 %v5944_v7  ;;  %2956 = vmatpush1.bf16.msra.mxu1 %v5947_v8  ;;  %v6019_v7 = vld [vmem:[#allocation2 + $0xf0] ss:$28 sps:$4 sm:$0xff]  }
 0x15c   :  { %2793 = vmatprep.subr.bf16.mxu0 %v5952_v9  ;;  %2957 = vmatprep.subr.bf16.mxu1 %v5955_v11  ;;  %v6024_v8 = vld [vmem:[#allocation2 + $0x12c] ss:$28 sps:$4 sm:$0xff]  }
 0x15d   :  { %v6053_v9 = vld [vmem:[#allocation2 + $0x2f0] ss:$28 sps:$4 sm:$0xff]   ;;  %v6022_v11 = vld [vmem:[#allocation2 + $0x128] ss:$28 sps:$4 sm:$0xff]  }
 0x15f   :  { %2794 = vmatpush1.bf16.msra.mxu0 %v5950_v12  ;;  %2958 = vmatpush1.bf16.msra.mxu1 %v5953_v14  ;;  %v6027_v12 = vld [vmem:[#allocation2 + $0x164] ss:$28 sps:$4 sm:$0xff]   ;;  %v6057_v14 = vld [vmem:[#allocation2 + $0x130] ss:$28 sps:$4 sm:$0xff]  }
 0x160   :  { %2804 = vmatprep.subr.bf16.mxu0 %v5959_v16  ;;  %2968 = vmatprep.subr.bf16.mxu1 %v5962_v17  ;;  %v6058_v16 = vld [vmem:[#allocation2 + $0x328] ss:$28 sps:$4 sm:$0xff]   ;;  %v6025_v17 = vld [vmem:[#allocation2 + $0x160] ss:$28 sps:$4 sm:$0xff]  }
 0x162   :  { %2796 = vmatmul.mubr.bf16.vlgmr.msra.gmra.mrb[0].mxu0 %v6961_v19  ;;  %2960 = vmatmul.mubr.bf16.vlgmr.msra.gmra.mrb[0].mxu1 %v6961_v19 }
 0x163   :  { %2805 = vmatpush1.bf16.msra.mxu0 %v5957_v18  ;;  %2969 = vmatpush1.bf16.msra.mxu1 %v5960_v20  ;;  %v6031_v18 = vld [vmem:[#allocation2 + $0x19c] ss:$28 sps:$4 sm:$0xff]   ;;  %v6062_v20 = vld [vmem:[#allocation2 + $0x168] ss:$28 sps:$4 sm:$0xff]  }
 0x164   :  { %2806 = vmatprep.subr.bf16.mxu0 %v5966_v21  ;;  %2970 = vmatprep.subr.bf16.mxu1 %v5969_v22  ;;  %v6063_v21 = vld [vmem:[#allocation2 + $0x360] ss:$28 sps:$4 sm:$0xff]   ;;  %v6029_v22 = vld [vmem:[#allocation2 + $0x198] ss:$28 sps:$4 sm:$0xff]  }
 0x165   :  { %2836 = vmatprep.mubr.bf16.mxu0 %v6733_v27  ;;  %3000 = vmatprep.mubr.bf16.mxu1 %v6733_v27 }
 0x167   :  { %2807 = vmatpush1.bf16.msra.mxu0 %v5964_v23  ;;  %2971 = vmatpush1.bf16.msra.mxu1 %v5967_v24  ;;  %v6036_v23 = vld [vmem:[#allocation2 + $0x1d4] ss:$28 sps:$4 sm:$0xff]   ;;  %v6067_v24 = vld [vmem:[#allocation2 + $0x1a0] ss:$28 sps:$4 sm:$0xff]  }
 0x168   :  { %2808 = vmatprep.subr.bf16.mxu0 %v5972_v25  ;;  %2972 = vmatprep.subr.bf16.mxu1 %v5975_v13  ;;  %v6068_v25 = vld [vmem:[#allocation2 + $0x558] ss:$28 sps:$4 sm:$0xff]   ;;  %v6034_v13 = vld [vmem:[#allocation2 + $0x1d0] ss:$28 sps:$4 sm:$0xff]  }
 0x16b   :  { %2809 = vmatpush1.bf16.msra.mxu0 %v5970_v26  ;;  %2973 = vmatpush1.bf16.msra.mxu1 %v5973_v28  ;;  %v6072_v26 = vld [vmem:[#allocation2 + $0x398] ss:$28 sps:$4 sm:$0xff]   ;;  %v6041_v28 = vld [vmem:[#allocation2 + $0x20c] ss:$28 sps:$4 sm:$0xff]  }
 0x16c   :  { %2810 = vmatprep.subr.bf16.mxu0 %v5978_v29  ;;  %2974 = vmatprep.subr.bf16.mxu1 %v5981_v31  ;;  %v6073_v29 = vld [vmem:[#allocation2 + $0x590] ss:$28 sps:$4 sm:$0xff]   ;;  %v6039_v31 = vld [vmem:[#allocation2 + $0x208] ss:$28 sps:$4 sm:$0xff]  }
 0x16f   :  { %2811 = vmatpush1.bf16.msra.mxu0 %v5976_v32  ;;  %2975 = vmatpush1.bf16.msra.mxu1 %v5979_v33  ;;  %v6077_v32 = vld [vmem:[#allocation2 + $0x3d0] ss:$28 sps:$4 sm:$0xff]   ;;  %v6046_v33 = vld [vmem:[#allocation2 + $0x244] ss:$28 sps:$4 sm:$0xff]  }
 0x170   :  { %2812 = vmatprep.subr.bf16.mxu0 %v5984_v34  ;;  %2976 = vmatprep.subr.bf16.mxu1 %v5987_v35  ;;  %v6078_v34 = vld [vmem:[#allocation2 + $0x5c8] ss:$28 sps:$4 sm:$0xff]   ;;  %v6044_v35 = vld [vmem:[#allocation2 + $0x240] ss:$28 sps:$4 sm:$0xff]  }
 0x173   :  { %2813 = vmatpush1.bf16.msra.mxu0 %v5982_v36  ;;  %2977 = vmatpush1.bf16.msra.mxu1 %v5985_v37  ;;  %v6082_v36 = vld [vmem:[#allocation2 + $0x408] ss:$28 sps:$4 sm:$0xff]   ;;  %v6051_v37 = vld [vmem:[#allocation2 + $0x27c] ss:$28 sps:$4 sm:$0xff]  }
 0x174   :  { %2814 = vmatprep.subr.bf16.mxu0 %v5990_v38  ;;  %2978 = vmatprep.subr.bf16.mxu1 %v5993_v39  ;;  %v6083_v38 = vld [vmem:[#allocation2 + $0x600] ss:$28 sps:$4 sm:$0xff]   ;;  %v6049_v39 = vld [vmem:[#allocation2 + $0x278] ss:$28 sps:$4 sm:$0xff]  }
 0x177   :  { %2815 = vmatpush1.bf16.msra.mxu0 %v5988_v40  ;;  %2979 = vmatpush1.bf16.msra.mxu1 %v5991_v41  ;;  %v6087_v40 = vld [vmem:[#allocation2 + $0x440] ss:$28 sps:$4 sm:$0xff]   ;;  %v6056_v41 = vld [vmem:[#allocation2 + $0x2b4] ss:$28 sps:$4 sm:$0xff]  }
 0x178   :  { %2816 = vmatprep.subr.bf16.mxu0 %v5996_v42  ;;  %2980 = vmatprep.subr.bf16.mxu1 %v5999_v43  ;;  %v6088_v42 = vld [vmem:[#allocation2 + $0x638] ss:$28 sps:$4 sm:$0xff]   ;;  %v6054_v43 = vld [vmem:[#allocation2 + $0x2b0] ss:$28 sps:$4 sm:$0xff]  }
 0x17b   :  { %2817 = vmatpush1.bf16.msra.mxu0 %v5994_v44  ;;  %2981 = vmatpush1.bf16.msra.mxu1 %v5997_v45  ;;  %v6092_v44 = vld [vmem:[#allocation2 + $0x478] ss:$28 sps:$4 sm:$0xff]   ;;  %v6061_v45 = vld [vmem:[#allocation2 + $0x2ec] ss:$28 sps:$4 sm:$0xff]  }
 0x17c   :  { %2818 = vmatprep.subr.bf16.mxu0 %v6002_v46  ;;  %2982 = vmatprep.subr.bf16.mxu1 %v6005_v47  ;;  %v6093_v46 = vld [vmem:[#allocation2 + $0x670] ss:$28 sps:$4 sm:$0xff]   ;;  %v6059_v47 = vld [vmem:[#allocation2 + $0x2e8] ss:$28 sps:$4 sm:$0xff]  }
 0x17f   :  { %2819 = vmatpush1.bf16.msra.mxu0 %v6000_v49  ;;  %2983 = vmatpush1.bf16.msra.mxu1 %v6003_v50  ;;  %v6097_v49 = vld [vmem:[#allocation2 + $0x4b0] ss:$28 sps:$4 sm:$0xff]   ;;  %v6066_v50 = vld [vmem:[#allocation2 + $0x324] ss:$28 sps:$4 sm:$0xff]  }
 0x180   :  { %3009 = vmatprep.subr.bf16.mxu0 %v6009_v51  ;;  %5475 = vmatprep.subr.bf16.mxu1 %v6028_v52  ;;  %v6098_v51 = vld [vmem:[#allocation2 + $0x6a8] ss:$28 sps:$4 sm:$0xff]   ;;  %v6064_v52 = vld [vmem:[#allocation2 + $0x320] ss:$28 sps:$4 sm:$0xff]  }
 0x182   :  { %2837 = vmatmul.mubr.bf16.vlgmr.msra.gmra.mrb[0].mxu0 %v6006_v53  ;;  %3001 = vmatmul.mubr.bf16.vlgmr.msra.gmra.mrb[0].mxu1 %v6006_v53  ;;  %v6071_v53 = vld [vmem:[#allocation2 + $0x35c] ss:$28 sps:$4 sm:$0xff]  }
 0x183   :  { %3010 = vmatpush1.bf16.msra.mxu0 %v6007_v54  ;;  %5476 = vmatpush3.bf16.msra.mxu1 %v6032_v55  ;;  %v6102_v54 = vld [vmem:[#allocation2 + $0x4e8] ss:$28 sps:$4 sm:$0xff]   ;;  %v6103_v55 = vld [vmem:[#allocation2 + $0x6e0] ss:$28 sps:$4 sm:$0xff]  }
 0x184   :  { %3011 = vmatprep.subr.bf16.mxu0 %v6012_v56  ;;  %5477 = vmatprep.subr.bf16.mxu1 %v6033_v57  ;;  %v6069_v56 = vld [vmem:[#allocation2 + $0x358] ss:$28 sps:$4 sm:$0xff]  }
 0x185   :  { %3205 = vmatprep.mubr.bf16.mxu1 %v6923_v48  ;;  %3041 = vmatprep.mubr.bf16.mxu0 %v6923_v48  ;;  %v6052_v48 = vld [vmem:[#allocation2 + $0xf8] ss:$28 sps:$4 sm:$0xff]  }
 0x186   :  { %v6076_v57 = vld [vmem:[#allocation2 + $0x394] ss:$28 sps:$4 sm:$0xff]  }
 0x187   :  { %3012 = vmatpush1.bf16.msra.mxu0 %v6010_v58  ;;  %5478 = vmatpush3.bf16.msra.mxu1 %v6037_v60  ;;  %v6107_v58 = vld [vmem:[#allocation2 + $0x520] ss:$28 sps:$4 sm:$0xff]   ;;  %v6074_v60 = vld [vmem:[#allocation2 + $0x390] ss:$28 sps:$4 sm:$0xff]  }
 0x188   :  { %3013 = vmatprep.subr.bf16.mxu0 %v6015_v59  ;;  %5479 = vmatprep.subr.bf16.mxu1 %v6038_v61  ;;  %v6108_v59 = vld [vmem:[#allocation2 + $0x8d8] ss:$28 sps:$4 sm:$0xff]   ;;  %v6081_v61 = vld [vmem:[#allocation2 + $0x3cc] ss:$28 sps:$4 sm:$0xff]  }
 0x18b   :  { %3014 = vmatpush1.bf16.msra.mxu0 %v6013_v62  ;;  %5480 = vmatpush3.bf16.msra.mxu1 %v6042_v0  ;;  %v6112_v62 = vld [vmem:[#allocation2 + $0x718] ss:$28 sps:$4 sm:$0xff]   ;;  %v6079_v0 = vld [vmem:[#allocation2 + $0x3c8] ss:$28 sps:$4 sm:$0xff]  }
 0x18c   :  { %3015 = vmatprep.subr.bf16.mxu0 %v6018_v63  ;;  %5481 = vmatprep.subr.bf16.mxu1 %v6043_v1  ;;  %v6113_v63 = vld [vmem:[#allocation2 + $0x910] ss:$28 sps:$4 sm:$0xff]   ;;  %v6086_v1 = vld [vmem:[#allocation2 + $0x404] ss:$28 sps:$4 sm:$0xff]  }
 0x18f   :  { %3016 = vmatpush1.bf16.msra.mxu0 %v6016_v2  ;;  %5482 = vmatpush3.bf16.msra.mxu1 %v6047_v4  ;;  %v6117_v2 = vld [vmem:[#allocation2 + $0x750] ss:$28 sps:$4 sm:$0xff]   ;;  %v6084_v4 = vld [vmem:[#allocation2 + $0x400] ss:$28 sps:$4 sm:$0xff]  }
 0x190   :  { %3017 = vmatprep.subr.bf16.mxu0 %v6021_v3  ;;  %5483 = vmatprep.subr.bf16.mxu1 %v6048_v6  ;;  %v6118_v3 = vld [vmem:[#allocation2 + $0x948] ss:$28 sps:$4 sm:$0xff]   ;;  %v6091_v6 = vld [vmem:[#allocation2 + $0x43c] ss:$28 sps:$4 sm:$0xff]  }
 0x193   :  { %3018 = vmatpush1.bf16.msra.mxu0 %v6019_v7  ;;  %5484 = vmatpush3.bf16.msra.mxu1 %v6052_v48  ;;  %v6122_v7 = vld [vmem:[#allocation2 + $0x788] ss:$28 sps:$4 sm:$0xff]   ;;  %v6089_v48 = vld [vmem:[#allocation2 + $0x438] ss:$28 sps:$4 sm:$0xff]  }
 0x194   :  { %3019 = vmatprep.subr.bf16.mxu0 %v6024_v8  ;;  %5485 = vmatprep.subr.bf16.mxu1 %v6053_v9  ;;  %v6096_v8 = vld [vmem:[#allocation2 + $0x474] ss:$28 sps:$4 sm:$0xff]   ;;  %v6127_v9 = vld [vmem:[#allocation2 + $0x7c0] ss:$28 sps:$4 sm:$0xff]  }
 0x197   :  { %3020 = vmatpush1.bf16.msra.mxu0 %v6022_v11  ;;  %5486 = vmatpush3.bf16.msra.mxu1 %v6057_v14  ;;  %v6128_v11 = vld [vmem:[#allocation2 + $0x9b8] ss:$28 sps:$4 sm:$0xff]   ;;  %v6101_v14 = vld [vmem:[#allocation2 + $0x4ac] ss:$28 sps:$4 sm:$0xff]  }
 0x198   :  { %3021 = vmatprep.subr.bf16.mxu0 %v6027_v12  ;;  %5487 = vmatprep.subr.bf16.mxu1 %v6058_v16  ;;  %v6094_v12 = vld [vmem:[#allocation2 + $0x470] ss:$28 sps:$4 sm:$0xff]  }
 0x199   :  { %v6133_v16 = vld [vmem:[#allocation2 + $0x9f0] ss:$28 sps:$4 sm:$0xff]  }
 0x19b   :  { %3022 = vmatpush1.bf16.msra.mxu0 %v6025_v17  ;;  %5488 = vmatpush3.bf16.msra.mxu1 %v6062_v20  ;;  %v6099_v17 = vld [vmem:[#allocation2 + $0x4a8] ss:$28 sps:$4 sm:$0xff]  }
 0x19c   :  { %3023 = vmatprep.subr.bf16.mxu0 %v6031_v18  ;;  %5489 = vmatprep.subr.bf16.mxu1 %v6063_v21  ;;  %v6137_v18 = vld [vmem:[#allocation2 + $0x830] ss:$28 sps:$4 sm:$0xff]   ;;  %v6106_v20 = vld [vmem:[#allocation2 + $0x4e4] ss:$28 sps:$4 sm:$0xff]  }
 0x19d   :  { %v6138_v21 = vld [vmem:[#allocation2 + $0xa28] ss:$28 sps:$4 sm:$0xff]  }
 0x19f   :  { %3024 = vmatpush1.bf16.msra.mxu0 %v6029_v22  ;;  %5490 = vmatpush3.bf16.msra.mxu1 %v6067_v24  ;;  %v6104_v22 = vld [vmem:[#allocation2 + $0x4e0] ss:$28 sps:$4 sm:$0xff]  }
 0x1a0   :  { %3025 = vmatprep.subr.bf16.mxu0 %v6036_v23  ;;  %5497 = vmatprep.subr.bf16.mxu1 %v6068_v25  ;;  %v6142_v23 = vld [vmem:[#allocation2 + $0x868] ss:$28 sps:$4 sm:$0xff]   ;;  %v6111_v24 = vld [vmem:[#allocation2 + $0x51c] ss:$28 sps:$4 sm:$0xff]  }
 0x1a1   :  { %v6143_v25 = vld [vmem:[#allocation2 + $0xa60] ss:$28 sps:$4 sm:$0xff]  }
 0x1a2   :  { %3206 = vmatmul.mubr.bf16.vlgmr.msra.gmra.mrb[4].mxu1 %v6927_v5 }
 0x1a3   :  { %3026 = vmatpush1.bf16.msra.mxu0 %v6034_v13  ;;  %5498 = vmatpush3.bf16.msra.mxu1 %v6072_v26  ;;  %v6109_v13 = vld [vmem:[#allocation2 + $0x518] ss:$28 sps:$4 sm:$0xff]   ;;  %v6147_v26 = vld [vmem:[#allocation2 + $0x8a0] ss:$28 sps:$4 sm:$0xff]  }
 0x1a4   :  { %3027 = vmatprep.subr.bf16.mxu0 %v6041_v28  ;;  %5499 = vmatprep.subr.bf16.mxu1 %v6073_v29  ;;  %v6116_v28 = vld [vmem:[#allocation2 + $0x554] ss:$28 sps:$4 sm:$0xff]  }
 0x1a5   :  { %3245 = vmatprep.mubr.bf16.mxu1 %v6938_v30  ;;  %v6114_v29 = vld [vmem:[#allocation2 + $0x550] ss:$28 sps:$4 sm:$0xff]  }
 0x1a7   :  { %3028 = vmatpush1.bf16.msra.mxu0 %v6039_v31  ;;  %5500 = vmatpush3.bf16.msra.mxu1 %v6077_v32  ;;  %v6151_v31 = vld [vmem:[#allocation2 + $0xa98] ss:$28 sps:$4 sm:$0xff]   ;;  %v6121_v32 = vld [vmem:[#allocation2 + $0x58c] ss:$28 sps:$4 sm:$0xff]  }
 0x1a8   :  { %3029 = vmatprep.subr.bf16.mxu0 %v6046_v33  ;;  %5501 = vmatprep.subr.bf16.mxu1 %v6078_v34  ;;  %v6734_v33 = vmov 0.0   ;;  %v6119_v34 = vld [vmem:[#allocation2 + $0x588] ss:$28 sps:$4 sm:$0xff]  }
 0x1ab   :  { %3030 = vmatpush1.bf16.msra.mxu0 %v6044_v35  ;;  %5502 = vmatpush3.bf16.msra.mxu1 %v6082_v36  ;;  %v6126_v35 = vld [vmem:[#allocation2 + $0x5c4] ss:$28 sps:$4 sm:$0xff]   ;;  %v6155_v36 = vld [vmem:[#allocation2 + $0xad0] ss:$28 sps:$4 sm:$0xff]  }
 0x1ac   :  { %3031 = vmatprep.subr.bf16.mxu0 %v6051_v37  ;;  %5503 = vmatprep.subr.bf16.mxu1 %v6083_v38  ;;  %v6124_v37 = vld [vmem:[#allocation2 + $0x5c0] ss:$28 sps:$4 sm:$0xff]  }
 0x1ad   :  { %v6131_v38 = vld [vmem:[#allocation2 + $0x5fc] ss:$28 sps:$4 sm:$0xff]  }
 0x1af   :  { %3032 = vmatpush1.bf16.msra.mxu0 %v6049_v39  ;;  %5504 = vmatpush3.bf16.msra.mxu1 %v6087_v40  ;;  %v6159_v39 = vld [vmem:[#allocation2 + $0xb08] ss:$28 sps:$4 sm:$0xff]   ;;  %v6129_v40 = vld [vmem:[#allocation2 + $0x5f8] ss:$28 sps:$4 sm:$0xff]  }
 0x1b0   :  { %3033 = vmatprep.subr.bf16.mxu0 %v6056_v41  ;;  %5505 = vmatprep.subr.bf16.mxu1 %v6088_v42  ;;  %v6136_v41 = vld [vmem:[#allocation2 + $0x634] ss:$28 sps:$4 sm:$0xff]   ;;  %v6163_v42 = vld [vmem:[#allocation2 + $0xb40] ss:$28 sps:$4 sm:$0xff]  }
 0x1b3   :  { %3034 = vmatpush1.bf16.msra.mxu0 %v6054_v43  ;;  %5506 = vmatpush3.bf16.msra.mxu1 %v6092_v44  ;;  %v6134_v43 = vld [vmem:[#allocation2 + $0x630] ss:$28 sps:$4 sm:$0xff]  }
 0x1b4   :  { %3035 = vmatprep.subr.bf16.mxu0 %v6061_v45  ;;  %5507 = vmatprep.subr.bf16.mxu1 %v6093_v46  ;;  %v6141_v44 = vld [vmem:[#allocation2 + $0x66c] ss:$28 sps:$4 sm:$0xff]   ;;  %v6167_v45 = vld [vmem:[#allocation2 + $0xb78] ss:$28 sps:$4 sm:$0xff]  }
 0x1b5   :  { %v6139_v46 = vld [vmem:[#allocation2 + $0x668] ss:$28 sps:$4 sm:$0xff]  }
 0x1b7   :  { %3036 = vmatpush1.bf16.msra.mxu0 %v6059_v47  ;;  %5508 = vmatpush3.bf16.msra.mxu1 %v6097_v49  ;;  %v6146_v47 = vld [vmem:[#allocation2 + $0x6a4] ss:$28 sps:$4 sm:$0xff]   ;;  %v6171_v49 = vld [vmem:[#allocation2 + $0xbb0] ss:$28 sps:$4 sm:$0xff]  }
 0x1b8   :  { %3037 = vmatprep.subr.bf16.mxu0 %v6066_v50  ;;  %5509 = vmatprep.subr.bf16.mxu1 %v6098_v51  ;;  %v6144_v50 = vld [vmem:[#allocation2 + $0x6a0] ss:$28 sps:$4 sm:$0xff]  }
 0x1b9   :  { %v6150_v51 = vld [vmem:[#allocation2 + $0x6dc] ss:$28 sps:$4 sm:$0xff]  }
 0x1bb   :  { %3038 = vmatpush1.bf16.msra.mxu0 %v6064_v52  ;;  %5510 = vmatpush3.bf16.msra.mxu1 %v6102_v54  ;;  %v6175_v52 = vld [vmem:[#allocation2 + $0xbe8] ss:$28 sps:$4 sm:$0xff]   ;;  %v6154_v54 = vld [vmem:[#allocation2 + $0x714] ss:$28 sps:$4 sm:$0xff]  }
 0x1bc   :  { %3039 = vmatprep.subr.bf16.mxu0 %v6071_v53  ;;  %5511 = vmatprep.subr.bf16.mxu1 %v6103_v55  ;;  %v6148_v53 = vld [vmem:[#allocation2 + $0x6d8] ss:$28 sps:$4 sm:$0xff]   ;;  %v6179_v55 = vld [vmem:[#allocation2 + $0xc20] ss:$28 sps:$4 sm:$0xff]  }
 0x1bf   :  { %3040 = vmatpush1.bf16.msra.mxu0 %v6069_v56  ;;  %5512 = vmatpush3.bf16.msra.mxu1 %v6107_v58  ;;  %v6182_v56 = vld [vmem:[#allocation6 + $0x4] ss:$8 sps:$4 sm:$0xff]  }
 0x1c0   :  { %3050 = vmatprep.subr.bf16.mxu0 %v6076_v57  ;;  %5519 = vmatprep.subr.bf16.mxu1 %v6108_v59  ;;  %v6152_v57 = vld [vmem:[#allocation2 + $0x710] ss:$28 sps:$4 sm:$0xff]  }
 0x1c1   :  { %v6158_v58 = vld [vmem:[#allocation2 + $0x74c] ss:$28 sps:$4 sm:$0xff]  }
 0x1c2   :  { %3042 = vmatmul.mubr.bf16.vlgmr.msra.gmra.mrb[4].mxu0 %v6927_v5  ;;  %3246 = vmatmul.mubr.bf16.vlgmr.msra.gmra.mrb[8].mxu1 %v6944_v10  ;;  %v6123_v5 = vld [vmem:[#allocation2 + $0x980] ss:$28 sps:$4 sm:$0xff]   ;;  %v6180_v59 = vld [vmem:[#allocation6] ss:$8 sps:$4 sm:$0xff]  }
 0x1c3   :  { %3051 = vmatpush1.bf16.msra.mxu0 %v6074_v60  ;;  %5520 = vmatpush3.bf16.msra.mxu1 %v6112_v62  ;;  %v6188_v60 = vld [vmem:[#allocation6 + $0x14] ss:$8 sps:$4 sm:$0xff]  }
 0x1c4   :  { %3052 = vmatprep.subr.bf16.mxu0 %v6081_v61  ;;  %5521 = vmatprep.subr.bf16.mxu1 %v6113_v63  ;;  %v6156_v61 = vld [vmem:[#allocation2 + $0x748] ss:$28 sps:$4 sm:$0xff]   ;;  %v6983_v63 = vld [vmem:[%s7078_s0 + $0x18] ss:$0 sps:$4 sm:$0xff]  }
 0x1c5   :  { %3285 = vmatprep.mubr.bf16.mxu1 %v6953_v15  ;;  %3082 = vmatprep.mubr.bf16.mxu0 %v6938_v30  ;;  %v6132_v30 = vld [vmem:[#allocation2 + $0x7f8] ss:$28 sps:$4 sm:$0xff]   ;;  %v6162_v62 = vld [vmem:[#allocation2 + $0x784] ss:$28 sps:$4 sm:$0xff]  }
 0x1c7   :  { %3053 = vmatpush1.bf16.msra.mxu0 %v6079_v0  ;;  %5522 = vmatpush3.bf16.msra.mxu1 %v6117_v2  ;;  %v6186_v0 = vld [vmem:[#allocation6 + $0x10] ss:$8 sps:$4 sm:$0xff]  }
 0x1c8   :  { %3054 = vmatprep.subr.bf16.mxu0 %v6086_v1  ;;  %5523 = vmatprep.subr.bf16.mxu1 %v6118_v3  ;;  %v6194_v1 = vld [vmem:[#allocation6 + $0x24] ss:$8 sps:$4 sm:$0xff]   ;;  %v6160_v2 = vld [vmem:[#allocation2 + $0x780] ss:$28 sps:$4 sm:$0xff]  }
 0x1c9   :  { %v6166_v3 = vld [vmem:[#allocation2 + $0x7bc] ss:$28 sps:$4 sm:$0xff]  }
 0x1cb   :  { %3055 = vmatpush1.bf16.msra.mxu0 %v6084_v4  ;;  %5524 = vmatpush3.bf16.msra.mxu1 %v6122_v7  ;;  %v6200_v4 = vld [vmem:[#allocation6 + $0x34] ss:$8 sps:$4 sm:$0xff]   ;;  %v6170_v7 = vld [vmem:[#allocation2 + $0x7f4] ss:$28 sps:$4 sm:$0xff]  }
 0x1cc   :  { %3056 = vmatprep.subr.bf16.mxu0 %v6091_v6  ;;  %5525 = vmatprep.subr.bf16.mxu1 %v6123_v5  ;;  %v6164_v6 = vld [vmem:[#allocation2 + $0x7b8] ss:$28 sps:$4 sm:$0xff]  }
 0x1cd   :  { %v6198_v5 = vld [vmem:[#allocation6 + $0x30] ss:$8 sps:$4 sm:$0xff]  }
 0x1cf   :  { %3057 = vmatpush1.bf16.msra.mxu0 %v6089_v48  ;;  %5526 = vmatpush3.bf16.msra.mxu1 %v6127_v9  ;;  %v6206_v48 = vld [vmem:[#allocation6 + $0x44] ss:$8 sps:$4 sm:$0xff]  }
 0x1d0   :  { %3058 = vmatprep.subr.bf16.mxu0 %v6096_v8  ;;  %5527 = vmatprep.subr.bf16.mxu1 %v6128_v11  ;;  %v6168_v8 = vld [vmem:[#allocation2 + $0x7f0] ss:$28 sps:$4 sm:$0xff]   ;;  %v6212_v11 = vld [vmem:[#allocation6 + $0x54] ss:$8 sps:$4 sm:$0xff]  }
 0x1d1   :  { %v6174_v9 = vld [vmem:[#allocation2 + $0x82c] ss:$28 sps:$4 sm:$0xff]  }
 0x1d3   :  { %3059 = vmatpush1.bf16.msra.mxu0 %v6094_v12  ;;  %5528 = vmatpush3.bf16.msra.mxu1 %v6132_v30  ;;  %v6172_v12 = vld [vmem:[#allocation2 + $0x828] ss:$28 sps:$4 sm:$0xff]  }
 0x1d4   :  { %3060 = vmatprep.subr.bf16.mxu0 %v6101_v14  ;;  %5529 = vmatprep.subr.bf16.mxu1 %v6133_v16  ;;  %v6210_v14 = vld [vmem:[#allocation6 + $0x50] ss:$8 sps:$4 sm:$0xff]   ;;  %v6218_v16 = vld [vmem:[#allocation6 + $0x64] ss:$8 sps:$4 sm:$0xff]  }
 0x1d5   :  { %v6178_v30 = vld [vmem:[#allocation2 + $0x864] ss:$28 sps:$4 sm:$0xff]  }
 0x1d7   :  { %3061 = vmatpush1.bf16.msra.mxu0 %v6099_v17  ;;  %5530 = vmatpush3.bf16.msra.mxu1 %v6137_v18  ;;  %v6176_v17 = vld [vmem:[#allocation2 + $0x860] ss:$28 sps:$4 sm:$0xff]   ;;  %v6216_v18 = vld [vmem:[#allocation6 + $0x60] ss:$8 sps:$4 sm:$0xff]  }
 0x1d8   :  { %3062 = vmatprep.subr.bf16.mxu0 %v6106_v20  ;;  %5531 = vmatprep.subr.bf16.mxu1 %v6138_v21  ;;  %v6185_v20 = vld [vmem:[#allocation2 + $0x89c] ss:$28 sps:$4 sm:$0xff]  }
 0x1d9   :  { %v6224_v21 = vld [vmem:[#allocation6 + $0x74] ss:$8 sps:$4 sm:$0xff]  }
 0x1db   :  { %3063 = vmatpush1.bf16.msra.mxu0 %v6104_v22  ;;  %5532 = vmatpush3.bf16.msra.mxu1 %v6142_v23  ;;  %v6183_v22 = vld [vmem:[#allocation2 + $0x898] ss:$28 sps:$4 sm:$0xff]  }
 0x1dc   :  { %3064 = vmatprep.subr.bf16.mxu0 %v6111_v24  ;;  %5533 = vmatprep.subr.bf16.mxu1 %v6143_v25  ;;  %v6222_v23 = vld [vmem:[#allocation6 + $0x70] ss:$8 sps:$4 sm:$0xff]   ;;  %v6191_v24 = vld [vmem:[#allocation2 + $0x8d4] ss:$28 sps:$4 sm:$0xff]  }
 0x1dd   :  { %v6230_v25 = vld [vmem:[#allocation6 + $0x84] ss:$8 sps:$4 sm:$0xff]  }
 0x1df   :  { %3065 = vmatpush1.bf16.msra.mxu0 %v6109_v13  ;;  %5534 = vmatpush3.bf16.msra.mxu1 %v6147_v26  ;;  %v6189_v13 = vld [vmem:[#allocation2 + $0x8d0] ss:$28 sps:$4 sm:$0xff]  }
 0x1e0   :  { %3066 = vmatprep.subr.bf16.mxu0 %v6116_v28  ;;  %5572 = vmatprep.subr.bf16.mxu1 %v6734_v33  ;;  %v6228_v26 = vld [vmem:[#allocation6 + $0x80] ss:$8 sps:$4 sm:$0xff]  }
 0x1e1   :  { %v6197_v28 = vld [vmem:[#allocation2 + $0x90c] ss:$28 sps:$4 sm:$0xff]  }
 0x1e2   :  { %3286 = vmatmul.mubr.bf16.vlgmr.msra.gmra.mrb[12].mxu1 %v6961_v19 }
 0x1e3   :  { %3067 = vmatpush1.bf16.msra.mxu0 %v6114_v29  ;;  %5573 = vmatpush3.bf16.msra.mxu1 %v6151_v31  ;;  %v6236_v29 = vld [vmem:[#allocation6 + $0x94] ss:$8 sps:$4 sm:$0xff]  }
 0x1e4   :  { %3068 = vmatprep.subr.bf16.mxu0 %v6121_v32  ;;  %5574 = vmatprep.subr.bf16.mxu1 %v6734_v33  ;;  %v6195_v31 = vld [vmem:[#allocation2 + $0x908] ss:$28 sps:$4 sm:$0xff]   ;;  %v6234_v32 = vld [vmem:[#allocation6 + $0x90] ss:$8 sps:$4 sm:$0xff]  }
 0x1e5   :  { %5588 = vmatprep.mubr.msk.bf16.mxu1 %vm6735_vm0, %v6734_v33 }
 0x1e7   :  { %3069 = vmatpush1.bf16.msra.mxu0 %v6119_v34  ;;  %5575 = vmatpush3.bf16.msra.mxu1 %v6155_v36  ;;  %v6242_v34 = vld [vmem:[#allocation6 + $0xa4] ss:$8 sps:$4 sm:$0xff]   ;;  %v6240_v36 = vld [vmem:[#allocation6 + $0xa0] ss:$8 sps:$4 sm:$0xff]  }
 0x1e8   :  { %3070 = vmatprep.subr.bf16.mxu0 %v6126_v35  ;;  %5576 = vmatprep.subr.bf16.mxu1 %v6734_v33  ;;  %v6201_v35 = vld [vmem:[#allocation2 + $0x940] ss:$28 sps:$4 sm:$0xff]  }
 0x1eb   :  { %3071 = vmatpush1.bf16.msra.mxu0 %v6124_v37  ;;  %5577 = vmatpush3.bf16.msra.mxu1 %v6159_v39  ;;  %v6209_v37 = vld [vmem:[#allocation2 + $0x97c] ss:$28 sps:$4 sm:$0xff]  }
 0x1ec   :  { %3072 = vmatprep.subr.bf16.mxu0 %v6131_v38  ;;  %5578 = vmatprep.subr.bf16.mxu1 %v6734_v33  ;;  %v6248_v38 = vld [vmem:[#allocation6 + $0xb4] ss:$8 sps:$4 sm:$0xff]   ;;  %v6207_v39 = vld [vmem:[#allocation2 + $0x978] ss:$28 sps:$4 sm:$0xff]  }
 0x1ef   :  { %3073 = vmatpush1.bf16.msra.mxu0 %v6129_v40  ;;  %5579 = vmatpush3.bf16.msra.mxu1 %v6163_v42  ;;  %v6246_v40 = vld [vmem:[#allocation6 + $0xb0] ss:$8 sps:$4 sm:$0xff]   ;;  %v6254_v42 = vld [vmem:[#allocation6 + $0xc4] ss:$8 sps:$4 sm:$0xff]  }
 0x1f0   :  { %3074 = vmatprep.subr.bf16.mxu0 %v6136_v41  ;;  %5580 = vmatprep.subr.bf16.mxu1 %v6734_v33  ;;  %v6215_v41 = vld [vmem:[#allocation2 + $0x9b4] ss:$28 sps:$4 sm:$0xff]  }
 0x1f3   :  { %3075 = vmatpush1.bf16.msra.mxu0 %v6134_v43  ;;  %5581 = vmatpush3.bf16.msra.mxu1 %v6167_v45  ;;  %v6213_v43 = vld [vmem:[#allocation2 + $0x9b0] ss:$28 sps:$4 sm:$0xff]  }
 0x1f4   :  { %3076 = vmatprep.subr.bf16.mxu0 %v6141_v44  ;;  %5582 = vmatprep.subr.bf16.mxu1 %v6734_v33  ;;  %v6252_v44 = vld [vmem:[#allocation6 + $0xc0] ss:$8 sps:$4 sm:$0xff]  }
 0x1f5   :  { %v6221_v45 = vld [vmem:[#allocation2 + $0x9ec] ss:$28 sps:$4 sm:$0xff]  }
 0x1f7   :  { %3077 = vmatpush1.bf16.msra.mxu0 %v6139_v46  ;;  %5583 = vmatpush3.bf16.msra.mxu1 %v6171_v49  ;;  %v6260_v46 = vld [vmem:[#allocation6 + $0xd4] ss:$8 sps:$4 sm:$0xff]   ;;  %v6258_v49 = vld [vmem:[#allocation6 + $0xd0] ss:$8 sps:$4 sm:$0xff]  }
 0x1f8   :  { %3078 = vmatprep.subr.bf16.mxu0 %v6146_v47  ;;  %5584 = vmatprep.subr.bf16.mxu1 %v6734_v33  ;;  %v6219_v47 = vld [vmem:[#allocation2 + $0x9e8] ss:$28 sps:$4 sm:$0xff]  }
 0x1fb   :  { %3079 = vmatpush1.bf16.msra.mxu0 %v6144_v50  ;;  %5585 = vmatpush3.bf16.msra.mxu1 %v6175_v52  ;;  %v6227_v50 = vld [vmem:[#allocation2 + $0xa24] ss:$28 sps:$4 sm:$0xff]  }
 0x1fc   :  { %3080 = vmatprep.subr.bf16.mxu0 %v6150_v51  ;;  %5586 = vmatprep.subr.bf16.mxu1 %v6734_v33  ;;  %v6203_v33 = vld [vmem:[#allocation2 + $0x944] ss:$28 sps:$4 sm:$0xff]   ;;  %v6266_v51 = vld [vmem:[#allocation6 + $0xe4] ss:$8 sps:$4 sm:$0xff]  }
 0x1fd   :  { %v6225_v52 = vld [vmem:[#allocation2 + $0xa20] ss:$28 sps:$4 sm:$0xff]  }
 0x1ff   :  { %3081 = vmatpush1.bf16.msra.mxu0 %v6148_v53  ;;  %5587 = vmatpush3.bf16.msra.mxu1 %v6179_v55  ;;  %v6264_v53 = vld [vmem:[#allocation6 + $0xe0] ss:$8 sps:$4 sm:$0xff]   ;;  %v6272_v55 = vld [vmem:[#allocation6 + $0xf4] ss:$8 sps:$4 sm:$0xff]  }
 0x200   :  { %3091 = vmatprep.subr.bf16.mxu0 %v6154_v54  ;;  %4031 = vmatprep.subr.bf16.mxu1 %v6182_v56  ;;  %v6233_v54 = vld [vmem:[#allocation2 + $0xa5c] ss:$28 sps:$4 sm:$0xff]  }
 0x201   :  { %v6231_v56 = vld [vmem:[#allocation2 + $0xa58] ss:$28 sps:$4 sm:$0xff]  }
 0x202   :  { %3083 = vmatmul.mubr.bf16.vlgmr.msra.gmra.mrb[4].mxu0 %v6944_v10  ;;  %5589 = vmatmul.mubr.bf16.vlgmr.msra.gmra.mrb[16].mxu1 %v6983_v63  ;;  %v6192_v10 = vld [vmem:[#allocation6 + $0x20] ss:$8 sps:$4 sm:$0xff]  }
 0x203   :  { %3092 = vmatpush1.bf16.msra.mxu0 %v6152_v57  ;;  %4032 = vmatpush1.bf16.msra.mxu1 %v6180_v59  ;;  %v6270_v57 = vld [vmem:[#allocation6 + $0xf0] ss:$8 sps:$4 sm:$0xff]   ;;  %v6278_v59 = vld [vmem:[#allocation6 + $0x104] ss:$8 sps:$4 sm:$0xff]  }
 0x204   :  { %3093 = vmatprep.subr.bf16.mxu0 %v6158_v58  ;;  %4033 = vmatprep.subr.bf16.mxu1 %v6188_v60  ;;  %v6239_v58 = vld [vmem:[#allocation2 + $0xa94] ss:$28 sps:$4 sm:$0xff]  }
 0x205   :  { %3123 = vmatprep.mubr.bf16.mxu0 %v6953_v15  ;;  %v6204_v15 = vld [vmem:[#allocation6 + $0x40] ss:$8 sps:$4 sm:$0xff]  }
 0x206   :  { %v6237_v60 = vld [vmem:[#allocation2 + $0xa90] ss:$28 sps:$4 sm:$0xff]  }
 0x207   :  { %3094 = vmatpush1.bf16.msra.mxu0 %v6156_v61  ;;  %4034 = vmatpush1.bf16.msra.mxu1 %v6186_v0  ;;  %v6245_v61 = vld [vmem:[#allocation2 + $0xacc] ss:$28 sps:$4 sm:$0xff]   ;;  %v6251_v0 = vld [vmem:[#allocation2 + $0xb04] ss:$28 sps:$4 sm:$0xff]  }
 0x208   :  { %3095 = vmatprep.subr.bf16.mxu0 %v6162_v62  ;;  %4035 = vmatprep.subr.bf16.mxu1 %v6194_v1  ;;  %v6243_v62 = vld [vmem:[#allocation2 + $0xac8] ss:$28 sps:$4 sm:$0xff]   ;;  %v605_v1 = vlaneseq }
 0x20b   :  { %3096 = vmatpush1.bf16.msra.mxu0 %v6160_v2  ;;  %4036 = vmatpush1.bf16.msra.mxu1 %v6192_v10  ;;  %v6249_v2 = vld [vmem:[#allocation2 + $0xb00] ss:$28 sps:$4 sm:$0xff]   ;;  %v6989_v10 = vshrl.u32 %v605_v1, 7 }
 0x20c   :  { %3097 = vmatprep.subr.bf16.mxu0 %v6166_v3  ;;  %4037 = vmatprep.subr.bf16.mxu1 %v6200_v4  ;;  %v6257_v3 = vld [vmem:[#allocation2 + $0xb3c] ss:$28 sps:$4 sm:$0xff]  }
 0x20d   :  { %v6255_v4 = vld [vmem:[#allocation2 + $0xb38] ss:$28 sps:$4 sm:$0xff]   ;;  %v6314_v1 = vld [vmem:[#allocation6 + $0x1b4] ss:$8 sps:$4 sm:$0xff]  }
 0x20f   :  { %3098 = vmatpush1.bf16.msra.mxu0 %v6164_v6  ;;  %4038 = vmatpush1.bf16.msra.mxu1 %v6198_v5  ;;  %v6263_v6 = vld [vmem:[#allocation2 + $0xb74] ss:$28 sps:$4 sm:$0xff]   ;;  %v6994_v5 = vld [vmem:[#allocation4] sm:$0xff] }
 0x210   :  { %3099 = vmatprep.subr.bf16.mxu0 %v6170_v7  ;;  %4039 = vmatprep.subr.bf16.mxu1 %v6206_v48  ;;  %v6992_v7 = vsub.s32 0, %v6989_v10  ;;  %v6997_v48 = vsub.s32 1, %v6989_v10 }
 0x213   :  { %3100 = vmatpush1.bf16.msra.mxu0 %v6168_v8  ;;  %4040 = vmatpush1.bf16.msra.mxu1 %v6204_v15  ;;  %v619_v8 = vsub.s32 3, %v6989_v10  ;;  %v608_v15 = vrot.slane %v6994_v5, %v6992_v7 }
 0x214   :  { %3101 = vmatprep.subr.bf16.mxu0 %v6174_v9  ;;  %4041 = vmatprep.subr.bf16.mxu1 %v6212_v11  ;;  %v6269_v9 = vld [vmem:[#allocation2 + $0xbac] ss:$28 sps:$4 sm:$0xff]   ;;  %v612_v11 = vrot.slane %v6994_v5, %v6997_v48 }
 0x217   :  { %3102 = vmatpush1.bf16.msra.mxu0 %v6172_v12  ;;  %4042 = vmatpush1.bf16.msra.mxu1 %v6210_v14  ;;  %v620_v12 = vrot.slane %v6994_v5, %v619_v8  ;;  %v6267_v14 = vld [vmem:[#allocation2 + $0xba8] ss:$28 sps:$4 sm:$0xff]   ;;  %v631_v8 = vsub.s32 6, %v6989_v10 }
 0x218   :  { %3103 = vmatprep.subr.bf16.mxu0 %v6178_v30  ;;  %4043 = vmatprep.subr.bf16.mxu1 %v6218_v16  ;;  %v6275_v30 = vld [vmem:[#allocation2 + $0xbe4] ss:$28 sps:$4 sm:$0xff]  }
 0x21b   :  { %3104 = vmatpush1.bf16.msra.mxu0 %v6176_v17  ;;  %4044 = vmatpush1.bf16.msra.mxu1 %v6216_v18 }
 0x21c   :  { %3105 = vmatprep.subr.bf16.mxu0 %v6185_v20  ;;  %4045 = vmatprep.subr.bf16.mxu1 %v6224_v21 }
 0x21f   :  { %3106 = vmatpush1.bf16.msra.mxu0 %v6183_v22  ;;  %4046 = vmatpush1.bf16.msra.mxu1 %v6222_v23 }
 0x220   :  { %3107 = vmatprep.subr.bf16.mxu0 %v6191_v24  ;;  %4047 = vmatprep.subr.bf16.mxu1 %v6230_v25 }
 0x223   :  { %3108 = vmatpush1.bf16.msra.mxu0 %v6189_v13  ;;  %4048 = vmatpush1.bf16.msra.mxu1 %v6228_v26  ;;  %v6273_v13 = vld [vmem:[#allocation2 + $0xbe0] ss:$28 sps:$4 sm:$0xff]  }
 0x224   :  { %3109 = vmatprep.subr.bf16.mxu0 %v6197_v28  ;;  %4049 = vmatprep.subr.bf16.mxu1 %v6236_v29 }
 0x227   :  { %3110 = vmatpush1.bf16.msra.mxu0 %v6195_v31  ;;  %4050 = vmatpush1.bf16.msra.mxu1 %v6234_v32  ;;  %v6281_v31 = vld [vmem:[#allocation2 + $0xc1c] ss:$28 sps:$4 sm:$0xff]  }
 0x228   :  { %3111 = vmatprep.subr.bf16.mxu0 %v6203_v33  ;;  %4051 = vmatprep.subr.bf16.mxu1 %v6242_v34 }
 0x22b   :  { %3112 = vmatpush1.bf16.msra.mxu0 %v6201_v35  ;;  %4052 = vmatpush1.bf16.msra.mxu1 %v6240_v36  ;;  %v6276_v35 = vld [vmem:[#allocation6 + $0x100] ss:$8 sps:$4 sm:$0xff]   ;;  %v6279_v36 = vld [vmem:[#allocation2 + $0xc18] ss:$28 sps:$4 sm:$0xff]  }
 0x22c   :  { %3113 = vmatprep.subr.bf16.mxu0 %v6209_v37  ;;  %4053 = vmatprep.subr.bf16.mxu1 %v6248_v38  ;;  %v6284_v38 = vld [vmem:[#allocation6 + $0x114] ss:$8 sps:$4 sm:$0xff]  }
 0x22f   :  { %3114 = vmatpush1.bf16.msra.mxu0 %v6207_v39  ;;  %4054 = vmatpush1.bf16.msra.mxu1 %v6246_v40  ;;  %v6282_v40 = vld [vmem:[#allocation6 + $0x110] ss:$8 sps:$4 sm:$0xff]  }
 0x230   :  { %3115 = vmatprep.subr.bf16.mxu0 %v6215_v41  ;;  %4055 = vmatprep.subr.bf16.mxu1 %v6254_v42  ;;  %v6287_v41 = vld [vmem:[#allocation6 + $0x124] ss:$8 sps:$4 sm:$0xff]   ;;  %v6285_v42 = vld [vmem:[#allocation6 + $0x120] ss:$8 sps:$4 sm:$0xff]  }
 0x233   :  { %3116 = vmatpush1.bf16.msra.mxu0 %v6213_v43  ;;  %4056 = vmatpush1.bf16.msra.mxu1 %v6252_v44  ;;  %v6290_v43 = vld [vmem:[#allocation6 + $0x134] ss:$8 sps:$4 sm:$0xff]   ;;  %v6288_v44 = vld [vmem:[#allocation6 + $0x130] ss:$8 sps:$4 sm:$0xff]  }
 0x234   :  { %3117 = vmatprep.subr.bf16.mxu0 %v6221_v45  ;;  %4057 = vmatprep.subr.bf16.mxu1 %v6260_v46  ;;  %v6293_v45 = vld [vmem:[#allocation6 + $0x144] ss:$8 sps:$4 sm:$0xff]   ;;  %v6291_v46 = vld [vmem:[#allocation6 + $0x140] ss:$8 sps:$4 sm:$0xff]  }
 0x237   :  { %3118 = vmatpush1.bf16.msra.mxu0 %v6219_v47  ;;  %4058 = vmatpush1.bf16.msra.mxu1 %v6258_v49  ;;  %v6296_v47 = vld [vmem:[#allocation6 + $0x154] ss:$8 sps:$4 sm:$0xff]   ;;  %v6294_v49 = vld [vmem:[#allocation6 + $0x150] ss:$8 sps:$4 sm:$0xff]  }
 0x238   :  { %3119 = vmatprep.subr.bf16.mxu0 %v6227_v50  ;;  %4059 = vmatprep.subr.bf16.mxu1 %v6266_v51  ;;  %v6299_v50 = vld [vmem:[#allocation6 + $0x164] ss:$8 sps:$4 sm:$0xff]   ;;  %v6297_v51 = vld [vmem:[#allocation6 + $0x160] ss:$8 sps:$4 sm:$0xff]  }
 0x23b   :  { %3120 = vmatpush1.bf16.msra.mxu0 %v6225_v52  ;;  %4060 = vmatpush1.bf16.msra.mxu1 %v6264_v53 }
 0x23c   :  { %3121 = vmatprep.subr.bf16.mxu0 %v6233_v54  ;;  %4061 = vmatprep.subr.bf16.mxu1 %v6272_v55  ;;  %v6300_v54 = vld [vmem:[#allocation6 + $0x170] ss:$8 sps:$4 sm:$0xff]  }
 0x23f   :  { %3122 = vmatpush1.bf16.msra.mxu0 %v6231_v56  ;;  %4062 = vmatpush1.bf16.msra.mxu1 %v6270_v57  ;;  %v6305_v57 = vld [vmem:[#allocation6 + $0x184] ss:$8 sps:$4 sm:$0xff]  }
 0x240   :  { %3132 = vmatprep.subr.bf16.mxu0 %v6239_v58  ;;  %4072 = vmatprep.subr.bf16.mxu1 %v6278_v59  ;;  %v6303_v59 = vld [vmem:[#allocation6 + $0x180] ss:$8 sps:$4 sm:$0xff]  }
 0x242   :  { %3124 = vmatmul.mubr.bf16.vlgmr.msra.gmra.mrb[4].mxu0 %v6961_v19  ;;  %v6261_v19 = vld [vmem:[#allocation2 + $0xb70] ss:$28 sps:$4 sm:$0xff]  }
 0x243   :  { %3133 = vmatpush1.bf16.msra.mxu0 %v6237_v60  ;;  %3164 = vmatprep.mubr.bf16.mxu0 %v6733_v27  ;;  %v6308_v60 = vld [vmem:[#allocation6 + $0x194] ss:$8 sps:$4 sm:$0xff]  }
 0x244   :  { %3134 = vmatprep.subr.bf16.mxu0 %v6245_v61  ;;  %v6306_v61 = vld [vmem:[#allocation6 + $0x190] ss:$8 sps:$4 sm:$0xff]  }
 0x247   :  { %3135 = vmatpush1.bf16.msra.mxu0 %v6243_v62  ;;  %v6311_v62 = vld [vmem:[#allocation6 + $0x1a4] ss:$8 sps:$4 sm:$0xff]  }
 0x248   :  { %3136 = vmatprep.subr.bf16.mxu0 %v6251_v0  ;;  %v6309_v0 = vld [vmem:[#allocation6 + $0x1a0] ss:$8 sps:$4 sm:$0xff]  }
 0x24b   :  { %3137 = vmatpush1.bf16.msra.mxu0 %v6249_v2  ;;  %v6312_v2 = vld [vmem:[#allocation6 + $0x1b0] ss:$8 sps:$4 sm:$0xff]  }
 0x24c   :  { %3138 = vmatprep.subr.bf16.mxu0 %v6257_v3  ;;  %v6317_v3 = vld [vmem:[#allocation6 + $0x1c4] ss:$8 sps:$4 sm:$0xff]  }
 0x24f   :  { %3139 = vmatpush1.bf16.msra.mxu0 %v6255_v4  ;;  %v6315_v4 = vld [vmem:[#allocation6 + $0x1c0] ss:$8 sps:$4 sm:$0xff]  }
 0x250   :  { %3140 = vmatprep.subr.bf16.mxu0 %v6263_v6  ;;  %v615_v6 = vsub.s32 2, %v6989_v10 }
 0x253   :  { %3141 = vmatpush1.bf16.msra.mxu0 %v6261_v19  ;;  %v6320_v19 = vld [vmem:[#allocation6 + $0x1d4] ss:$8 sps:$4 sm:$0xff]  }
 0x254   :  { %3142 = vmatprep.subr.bf16.mxu0 %v6269_v9  ;;  %v6318_v9 = vld [vmem:[#allocation6 + $0x1d0] ss:$8 sps:$4 sm:$0xff]  }
 0x255   :  { %v2838_v16 = vpop.f32.mrb[0].mxu0  ;;  %v7005_v17 = vpop.f32.mrb[0].mxu1 }
 0x256   :  { %v5592_v18 = vadd.f32 %v2838_v16, %v608_v15  ;;  %v2840_v20 = vpop.f32.mrb[1].mxu0  ;;  %v3004_v21 = vpop.f32.mrb[1].mxu1  ;;  %v616_v15 = vrot.slane %v6994_v5, %v615_v6  ;;  %v6326_v16 = vld [vmem:[#allocation6 + $0x1f4] ss:$8 sps:$4 sm:$0xff]  }
 0x257   :  { %v5593_v22 = vadd.f32 %v2840_v20, %v612_v11  ;;  %v5595_v23 = vadd.f32 %v3004_v21, %v620_v12  ;;  %v2842_v24 = vpop.f32.mrb[2].mxu0  ;;  %v3006_v25 = vpop.f32.mrb[2].mxu1  ;;  %3143 = vmatpush1.bf16.msra.mxu0 %v6267_v14  ;;  %v6323_v11 = vld [vmem:[#allocation6 + $0x1e4] ss:$8 sps:$4 sm:$0xff]   ;;  %v632_v12 = vrot.slane %v6994_v5, %v631_v8  ;;  %v6321_v14 = vld [vmem:[#allocation6 + $0x1e0] ss:$8 sps:$4 sm:$0xff]  }
 0x258   :  { %v3333_v26 = vmax.f32 %v5592_v18, 0.0  ;;  %v2843_v28 = vpop.f32.mrb[3].mxu0  ;;  %v3007_v29 = vpop.f32.mrb[3].mxu1  ;;  %3144 = vmatprep.subr.bf16.mxu0 %v6275_v30  ;;  %v5594_v30 = vadd.f32 %v7005_v17, %v616_v15  ;;  %v6330_v17 = vld [vmem:[#allocation6 + $0x210] ss:$8 sps:$4 sm:$0xff]  }
 0x259   :  { %v3334_v32 = vmax.f32 %v5593_v22, 0.0  ;;  %v3336_v33 = vmax.f32 %v5595_v23, 0.0  ;;  %v6324_v22 = vld [vmem:[#allocation6 + $0x1f0] ss:$8 sps:$4 sm:$0xff]   ;;  %v6327_v29 = vld [vmem:[#allocation6 + $0x200] ss:$8 sps:$4 sm:$0xff]  }
 0x25a   :  { %v3340_v37 = vpack.c.bf16 %v3333_v26, %v3333_v26  ;;  %v3335_v25 = vmax.f32 %v5594_v30, 0.0  ;;  %v6329_v26 = vld [vmem:[#allocation6 + $0x204] ss:$8 sps:$4 sm:$0xff]   ;;  %v6402_v30 = vld [vmem:[#allocation9 + $0x10] ss:$8 sps:$4 sm:$0xff]  }
 0x25b   :  { %v3341_v34 = vpack.c.bf16 %v3334_v32, %v3334_v32  ;;  %3145 = vmatpush1.bf16.msra.mxu0 %v6273_v13  ;;  %v3343_v39 = vpack.c.bf16 %v3336_v33, %v3336_v33  ;;  %v6332_v32 = vld [vmem:[#allocation6 + $0x214] ss:$8 sps:$4 sm:$0xff]   ;;  %v6335_v33 = vld [vmem:[#allocation6 + $0x224] ss:$8 sps:$4 sm:$0xff]  }
 0x25c   :  { %3146 = vmatprep.subr.bf16.mxu0 %v6281_v31  ;;  %v3342_v31 = vpack.c.bf16 %v3335_v25, %v3335_v25  ;;  %v6414_v25 = vld [vmem:[#allocation9 + $0x50] ss:$8 sps:$4 sm:$0xff]  }
 0x25d   :  { %4063 = vmatprep.mubr.bf16.mxu1 %v3341_v34  ;;  %v6333_v34 = vld [vmem:[#allocation6 + $0x220] ss:$8 sps:$4 sm:$0xff]  }
 0x25e   :  { %4064 = vmatmul.mubr.bf16.vlgmr.msra.gmra.mrb[20].mxu1 %v3340_v37  ;;  %v6341_v37 = vld [vmem:[#allocation6 + $0x244] ss:$8 sps:$4 sm:$0xff]  }
 0x25f   :  { %4073 = vmatpush1.bf16.msra.mxu1 %v6276_v35  ;;  %3147 = vmatpush1.bf16.msra.mxu0 %v6279_v36  ;;  %v6338_v35 = vld [vmem:[#allocation6 + $0x234] ss:$8 sps:$4 sm:$0xff]   ;;  %v6336_v36 = vld [vmem:[#allocation6 + $0x230] ss:$8 sps:$4 sm:$0xff]  }
 0x260   :  { %4104 = vmatprep.mubr.bf16.mxu1 %v3343_v39  ;;  %4074 = vmatprep.subr.bf16.mxu1 %v6284_v38  ;;  %v6339_v38 = vld [vmem:[#allocation6 + $0x240] ss:$8 sps:$4 sm:$0xff]   ;;  %v6344_v39 = vld [vmem:[#allocation6 + $0x254] ss:$8 sps:$4 sm:$0xff]  }
 0x262   :  { %3165 = vmatmul.mubr.bf16.vlgmr.msra.gmra.mrb[4].mxu0 %v6983_v63  ;;  %v6302_v63 = vld [vmem:[#allocation6 + $0x174] ss:$8 sps:$4 sm:$0xff]  }
 0x263   :  { %4075 = vmatpush1.bf16.msra.mxu1 %v6282_v40  ;;  %v6342_v40 = vld [vmem:[#allocation6 + $0x250] ss:$8 sps:$4 sm:$0xff]  }
 0x264   :  { %4076 = vmatprep.subr.bf16.mxu1 %v6287_v41  ;;  %v6347_v41 = vld [vmem:[#allocation6 + $0x264] ss:$8 sps:$4 sm:$0xff]  }
 0x267   :  { %4077 = vmatpush1.bf16.msra.mxu1 %v6285_v42  ;;  %v6345_v42 = vld [vmem:[#allocation6 + $0x260] ss:$8 sps:$4 sm:$0xff]  }
 0x268   :  { %4078 = vmatprep.subr.bf16.mxu1 %v6290_v43  ;;  %v6350_v43 = vld [vmem:[#allocation6 + $0x274] ss:$8 sps:$4 sm:$0xff]  }
 0x26b   :  { %4079 = vmatpush1.bf16.msra.mxu1 %v6288_v44 }
 0x26c   :  { %4080 = vmatprep.subr.bf16.mxu1 %v6293_v45 }
 0x26f   :  { %4081 = vmatpush1.bf16.msra.mxu1 %v6291_v46 }
 0x270   :  { %4082 = vmatprep.subr.bf16.mxu1 %v6296_v47 }
 0x273   :  { %4083 = vmatpush1.bf16.msra.mxu1 %v6294_v49  ;;  %v6348_v49 = vld [vmem:[#allocation6 + $0x270] ss:$8 sps:$4 sm:$0xff]  }
 0x274   :  { %4084 = vmatprep.subr.bf16.mxu1 %v6299_v50 }
 0x275   :  { %v5491_v52 = vpop.f32.mrb[4].mxu1 }
 0x276   :  { %v5492_v53 = vpop.f32.mrb[5].mxu1 }
 0x277   :  { %4085 = vmatpush1.bf16.msra.mxu1 %v6297_v51  ;;  %v5493_v55 = vadd.f32 %v5492_v53, %v5491_v52  ;;  %v5494_v56 = vpop.f32.mrb[6].mxu1  ;;  %v6353_v51 = vld [vmem:[#allocation6 + $0x284] ss:$8 sps:$4 sm:$0xff]   ;;  %v6351_v52 = vld [vmem:[#allocation6 + $0x280] ss:$8 sps:$4 sm:$0xff]  }
 0x278   :  { %4086 = vmatprep.subr.bf16.mxu1 %v6302_v63  ;;  %v5495_v58 = vpop.f32.mrb[7].mxu1  ;;  %v6356_v53 = vld [vmem:[#allocation6 + $0x294] ss:$8 sps:$4 sm:$0xff]   ;;  %v6357_v56 = vld [vmem:[#allocation6 + $0x2a0] ss:$8 sps:$4 sm:$0xff]  }
 0x279   :  { %v3208_v18 = vadd.f32 %v5493_v55, %v632_v12  ;;  %v6359_v55 = vld [vmem:[#allocation6 + $0x2a4] ss:$8 sps:$4 sm:$0xff]   ;;  %v6360_v58 = vld [vmem:[#allocation6 + $0x2b0] ss:$8 sps:$4 sm:$0xff]  }
 0x27a   :  { %v6401_v12 = vld [vmem:[#allocation9 + $0x4] ss:$8 sps:$4 sm:$0xff]  }
 0x27b   :  { %4087 = vmatpush1.bf16.msra.mxu1 %v6300_v54  ;;  %v6354_v54 = vld [vmem:[#allocation6 + $0x290] ss:$8 sps:$4 sm:$0xff]   ;;  %4403 = vmatprep.subr.bf16.mxu0 %v6401_v12 }
 0x27c   :  { %4088 = vmatprep.subr.bf16.mxu1 %v6305_v57  ;;  %v6362_v57 = vld [vmem:[#allocation6 + $0x2b4] ss:$8 sps:$4 sm:$0xff]  }
 0x27d   :  { %v6444_v12 = vld [vmem:[#allocation9 + $0xf0] ss:$8 sps:$4 sm:$0xff]  }
 0x27f   :  { %4089 = vmatpush1.bf16.msra.mxu1 %v6303_v59  ;;  %v6365_v59 = vld [vmem:[#allocation6 + $0x2c4] ss:$8 sps:$4 sm:$0xff]  }
 0x280   :  { %4090 = vmatprep.subr.bf16.mxu1 %v6308_v60  ;;  %v6363_v60 = vld [vmem:[#allocation6 + $0x2c0] ss:$8 sps:$4 sm:$0xff]  }
 0x283   :  { %4091 = vmatpush1.bf16.msra.mxu1 %v6306_v61  ;;  %v6368_v61 = vld [vmem:[#allocation6 + $0x2d4] ss:$8 sps:$4 sm:$0xff]  }
 0x284   :  { %4092 = vmatprep.subr.bf16.mxu1 %v6311_v62  ;;  %v6366_v62 = vld [vmem:[#allocation6 + $0x2d0] ss:$8 sps:$4 sm:$0xff]  }
 0x287   :  { %4093 = vmatpush1.bf16.msra.mxu1 %v6309_v0  ;;  %v6371_v0 = vld [vmem:[#allocation6 + $0x2e4] ss:$8 sps:$4 sm:$0xff]  }
 0x288   :  { %4094 = vmatprep.subr.bf16.mxu1 %v6314_v1  ;;  %v6369_v1 = vld [vmem:[#allocation6 + $0x2e0] ss:$8 sps:$4 sm:$0xff]  }
 0x28b   :  { %4095 = vmatpush1.bf16.msra.mxu1 %v6312_v2  ;;  %v6374_v2 = vld [vmem:[#allocation6 + $0x2f4] ss:$8 sps:$4 sm:$0xff]  }
 0x28c   :  { %4096 = vmatprep.subr.bf16.mxu1 %v6317_v3 }
 0x28f   :  { %4097 = vmatpush1.bf16.msra.mxu1 %v6315_v4 }
 0x290   :  { %4098 = vmatprep.subr.bf16.mxu1 %v6320_v19  ;;  %v6372_v19 = vld [vmem:[#allocation6 + $0x2f0] ss:$8 sps:$4 sm:$0xff]  }
 0x293   :  { %4099 = vmatpush1.bf16.msra.mxu1 %v6318_v9  ;;  %v6377_v9 = vld [vmem:[#allocation6 + $0x304] ss:$8 sps:$4 sm:$0xff]  }
 0x294   :  { %4100 = vmatprep.subr.bf16.mxu1 %v6323_v11  ;;  %v6399_v11 = vld [vmem:[#allocation9] ss:$8 sps:$4 sm:$0xff]  }
 0x295   :  { %v5513_v20 = vpop.f32.mrb[8].mxu1  ;;  %4404 = vmatpush1.bf16.msra.mxu0 %v6399_v11  ;;  %v6446_v11 = vld [vmem:[#allocation9 + $0xf4] ss:$8 sps:$4 sm:$0xff]  }
 0x296   :  { %v5514_v21 = vpop.f32.mrb[9].mxu1 }
 0x297   :  { %4101 = vmatpush1.bf16.msra.mxu1 %v6321_v14  ;;  %v5515_v23 = vadd.f32 %v5514_v21, %v5513_v20  ;;  %v5516_v24 = vpop.f32.mrb[10].mxu1  ;;  %v6404_v14 = vld [vmem:[#allocation9 + $0x14] ss:$8 sps:$4 sm:$0xff]   ;;  %v6408_v21 = vld [vmem:[#allocation9 + $0x30] ss:$8 sps:$4 sm:$0xff]  }
 0x298   :  { %4102 = vmatprep.subr.bf16.mxu1 %v6326_v16  ;;  %v5517_v13 = vpop.f32.mrb[11].mxu1  ;;  %4405 = vmatprep.subr.bf16.mxu0 %v6404_v14  ;;  %v6407_v16 = vld [vmem:[#allocation9 + $0x24] ss:$8 sps:$4 sm:$0xff]   ;;  %v6410_v20 = vld [vmem:[#allocation9 + $0x34] ss:$8 sps:$4 sm:$0xff]  }
 0x299   :  { %v3248_v28 = vadd.f32 %v5515_v23, %v3208_v18  ;;  %4406 = vmatpush1.bf16.msra.mxu0 %v6402_v30  ;;  %v6405_v18 = vld [vmem:[#allocation9 + $0x20] ss:$8 sps:$4 sm:$0xff]   ;;  %v6416_v24 = vld [vmem:[#allocation9 + $0x54] ss:$8 sps:$4 sm:$0xff]   ;;  %v6419_v13 = vld [vmem:[#allocation9 + $0x64] ss:$8 sps:$4 sm:$0xff]  }
 0x29a   :  { %4407 = vmatprep.subr.bf16.mxu0 %v6407_v16  ;;  %v6411_v23 = vld [vmem:[#allocation9 + $0x40] ss:$8 sps:$4 sm:$0xff]   ;;  %v3459_v30 = vld [vmem:[#allocation7] sm:$0x3] }
 0x29b   :  { %4103 = vmatpush1.bf16.msra.mxu1 %v6324_v22  ;;  %v6413_v22 = vld [vmem:[#allocation9 + $0x44] ss:$8 sps:$4 sm:$0xff]   ;;  %v3464_v16 = vrot.slane %v3459_v30, %v6992_v7 }
 0x29c   :  { %4113 = vmatprep.subr.bf16.mxu1 %v6329_v26  ;;  %v6417_v26 = vld [vmem:[#allocation9 + $0x60] ss:$8 sps:$4 sm:$0xff]  }
 0x29d   :  { %4408 = vmatpush1.bf16.msra.mxu0 %v6405_v18  ;;  %v6449_v14 = vld [vmem:[#allocation12 + $0x4] ss:$8 sps:$4 sm:$0xff]   ;;  %v3468_v18 = vrot.slane %v3459_v30, %v6997_v48 }
 0x29e   :  { %4105 = vmatmul.mubr.bf16.vlgmr.msra.gmra.mrb[20].mxu1 %v3342_v31  ;;  %4409 = vmatprep.subr.bf16.mxu0 %v6410_v20  ;;  %v6425_v31 = vld [vmem:[#allocation9 + $0x84] ss:$8 sps:$4 sm:$0xff]  }
 0x29f   :  { %4114 = vmatpush1.bf16.msra.mxu1 %v6327_v29  ;;  %v6420_v29 = vld [vmem:[#allocation9 + $0x70] ss:$8 sps:$4 sm:$0xff]   ;;  %v6500_v30 = vld [vmem:[%s7087_s9 + $0x10] sm:$0xff]  }
 0x2a0   :  { %4115 = vmatprep.subr.bf16.mxu1 %v6332_v32  ;;  %v6423_v32 = vld [vmem:[#allocation9 + $0x80] ss:$8 sps:$4 sm:$0xff]  }
 0x2a1   :  { %4410 = vmatpush1.bf16.msra.mxu0 %v6408_v21 }
 0x2a2   :  { %4411 = vmatprep.subr.bf16.mxu0 %v6413_v22 }
 0x2a3   :  { %4116 = vmatpush1.bf16.msra.mxu1 %v6330_v17  ;;  %v6428_v17 = vld [vmem:[#allocation9 + $0x94] ss:$8 sps:$4 sm:$0xff]  }
 0x2a4   :  { %4117 = vmatprep.subr.bf16.mxu1 %v6335_v33  ;;  %v6426_v33 = vld [vmem:[#allocation9 + $0x90] ss:$8 sps:$4 sm:$0xff]  }
 0x2a5   :  { %4412 = vmatpush1.bf16.msra.mxu0 %v6411_v23 }
 0x2a6   :  { %4413 = vmatprep.subr.bf16.mxu0 %v6416_v24 }
 0x2a7   :  { %4118 = vmatpush1.bf16.msra.mxu1 %v6333_v34  ;;  %v6431_v34 = vld [vmem:[#allocation9 + $0xa4] ss:$8 sps:$4 sm:$0xff]  }
 0x2a8   :  { %4119 = vmatprep.subr.bf16.mxu1 %v6338_v35  ;;  %v6429_v35 = vld [vmem:[#allocation9 + $0xa0] ss:$8 sps:$4 sm:$0xff]  }
 0x2a9   :  { %4414 = vmatpush1.bf16.msra.mxu0 %v6414_v25 }
 0x2aa   :  { %4415 = vmatprep.subr.bf16.mxu0 %v6419_v13 }
 0x2ab   :  { %4120 = vmatpush1.bf16.msra.mxu1 %v6336_v36  ;;  %v6434_v36 = vld [vmem:[#allocation9 + $0xb4] ss:$8 sps:$4 sm:$0xff]  }
 0x2ac   :  { %4121 = vmatprep.subr.bf16.mxu1 %v6341_v37  ;;  %v6432_v37 = vld [vmem:[#allocation9 + $0xb0] ss:$8 sps:$4 sm:$0xff]  }
 0x2ad   :  { %4416 = vmatpush1.bf16.msra.mxu0 %v6417_v26 }
 0x2af   :  { %4122 = vmatpush1.bf16.msra.mxu1 %v6339_v38  ;;  %v6437_v38 = vld [vmem:[#allocation9 + $0xc4] ss:$8 sps:$4 sm:$0xff]  }
 0x2b0   :  { %4123 = vmatprep.subr.bf16.mxu1 %v6344_v39  ;;  %v6435_v39 = vld [vmem:[#allocation9 + $0xc0] ss:$8 sps:$4 sm:$0xff]  }
 0x2b3   :  { %4124 = vmatpush1.bf16.msra.mxu1 %v6342_v40  ;;  %v6440_v40 = vld [vmem:[#allocation9 + $0xd4] ss:$8 sps:$4 sm:$0xff]  }
 0x2b4   :  { %4125 = vmatprep.subr.bf16.mxu1 %v6347_v41  ;;  %v6438_v41 = vld [vmem:[#allocation9 + $0xd0] ss:$8 sps:$4 sm:$0xff]  }
 0x2b5   :  { %v5535_v44 = vpop.f32.mrb[12].mxu1 }
 0x2b6   :  { %v5536_v45 = vpop.f32.mrb[13].mxu1 }
 0x2b7   :  { %v5537_v46 = vadd.f32 %v5536_v45, %v5535_v44  ;;  %v5538_v47 = vpop.f32.mrb[14].mxu1  ;;  %4126 = vmatpush1.bf16.msra.mxu1 %v6345_v42  ;;  %v623_v42 = vsub.s32 4, %v6989_v10 }
 0x2b8   :  { %v5539_v50 = vpop.f32.mrb[15].mxu1  ;;  %4127 = vmatprep.subr.bf16.mxu1 %v6350_v43  ;;  %v627_v43 = vsub.s32 5, %v6989_v10  ;;  %v6378_v10 = vld [vmem:[#allocation6 + $0x310] ss:$8 sps:$4 sm:$0xff]  }
 0x2b9   :  { %v3288_v63 = vadd.f32 %v5537_v46, %v3248_v28  ;;  %v6422_v28 = vld [vmem:[#allocation9 + $0x74] ss:$8 sps:$4 sm:$0xff]   ;;  %v624_v44 = vrot.slane %v6994_v5, %v623_v42 }
 0x2ba   :  { %4417 = vmatprep.subr.bf16.mxu0 %v6422_v28  ;;  %v628_v45 = vrot.slane %v6994_v5, %v627_v43  ;;  %v6383_v5 = vld [vmem:[#allocation6 + $0x324] ss:$8 sps:$4 sm:$0xff]   ;;  %v6470_v42 = vld [vmem:[#allocation12 + $0x74] ss:$8 sps:$4 sm:$0xff]   ;;  %v6468_v43 = vld [vmem:[#allocation12 + $0x70] ss:$8 sps:$4 sm:$0xff]  }
 0x2bb   :  { %4128 = vmatpush1.bf16.msra.mxu1 %v6348_v49  ;;  %4418 = vmatpush1.bf16.msra.mxu0 %v6420_v29  ;;  %v6447_v28 = vld [vmem:[#allocation12] ss:$8 sps:$4 sm:$0xff]  }
 0x2bc   :  { %4129 = vmatprep.subr.bf16.mxu1 %v6353_v51  ;;  %4419 = vmatprep.subr.bf16.mxu0 %v6425_v31  ;;  %v6452_v31 = vld [vmem:[#allocation12 + $0x14] ss:$8 sps:$4 sm:$0xff]  }
 0x2bf   :  { %4130 = vmatpush1.bf16.msra.mxu1 %v6351_v52  ;;  %4420 = vmatpush1.bf16.msra.mxu0 %v6423_v32  ;;  %v6450_v32 = vld [vmem:[#allocation12 + $0x10] ss:$8 sps:$4 sm:$0xff]  }
 0x2c0   :  { %4131 = vmatprep.subr.bf16.mxu1 %v6356_v53  ;;  %4421 = vmatprep.subr.bf16.mxu0 %v6428_v17  ;;  %v6455_v17 = vld [vmem:[#allocation12 + $0x24] ss:$8 sps:$4 sm:$0xff]  }
 0x2c3   :  { %4132 = vmatpush1.bf16.msra.mxu1 %v6354_v54  ;;  %4422 = vmatpush1.bf16.msra.mxu0 %v6426_v33  ;;  %v6453_v33 = vld [vmem:[#allocation12 + $0x20] ss:$8 sps:$4 sm:$0xff]  }
 0x2c4   :  { %4133 = vmatprep.subr.bf16.mxu1 %v6359_v55  ;;  %4423 = vmatprep.subr.bf16.mxu0 %v6431_v34  ;;  %v6375_v55 = vld [vmem:[#allocation6 + $0x300] ss:$8 sps:$4 sm:$0xff]  }
 0x2c5   :  { %v6458_v34 = vld [vmem:[#allocation12 + $0x34] ss:$8 sps:$4 sm:$0xff]  }
 0x2c7   :  { %4134 = vmatpush1.bf16.msra.mxu1 %v6357_v56  ;;  %4424 = vmatpush1.bf16.msra.mxu0 %v6429_v35  ;;  %v6456_v35 = vld [vmem:[#allocation12 + $0x30] ss:$8 sps:$4 sm:$0xff]  }
 0x2c8   :  { %4135 = vmatprep.subr.bf16.mxu1 %v6362_v57  ;;  %4425 = vmatprep.subr.bf16.mxu0 %v6434_v36  ;;  %v6380_v57 = vld [vmem:[#allocation6 + $0x314] ss:$8 sps:$4 sm:$0xff]   ;;  %v6461_v36 = vld [vmem:[#allocation12 + $0x44] ss:$8 sps:$4 sm:$0xff]  }
 0x2cb   :  { %4136 = vmatpush1.bf16.msra.mxu1 %v6360_v58  ;;  %4426 = vmatpush1.bf16.msra.mxu0 %v6432_v37  ;;  %v6381_v58 = vld [vmem:[#allocation6 + $0x320] ss:$8 sps:$4 sm:$0xff]   ;;  %v6459_v37 = vld [vmem:[#allocation12 + $0x40] ss:$8 sps:$4 sm:$0xff]  }
 0x2cc   :  { %4137 = vmatprep.subr.bf16.mxu1 %v6365_v59  ;;  %4427 = vmatprep.subr.bf16.mxu0 %v6437_v38  ;;  %v6386_v59 = vld [vmem:[#allocation6 + $0x334] ss:$8 sps:$4 sm:$0xff]   ;;  %v6464_v38 = vld [vmem:[#allocation12 + $0x54] ss:$8 sps:$4 sm:$0xff]  }
 0x2cf   :  { %4138 = vmatpush1.bf16.msra.mxu1 %v6363_v60  ;;  %4428 = vmatpush1.bf16.msra.mxu0 %v6435_v39  ;;  %v6384_v60 = vld [vmem:[#allocation6 + $0x330] ss:$8 sps:$4 sm:$0xff]   ;;  %v6462_v39 = vld [vmem:[#allocation12 + $0x50] ss:$8 sps:$4 sm:$0xff]  }
 0x2d0   :  { %4139 = vmatprep.subr.bf16.mxu1 %v6368_v61  ;;  %4429 = vmatprep.subr.bf16.mxu0 %v6440_v40  ;;  %v6389_v61 = vld [vmem:[#allocation6 + $0x344] ss:$8 sps:$4 sm:$0xff]   ;;  %v6467_v40 = vld [vmem:[#allocation12 + $0x64] ss:$8 sps:$4 sm:$0xff]  }
 0x2d3   :  { %4140 = vmatpush1.bf16.msra.mxu1 %v6366_v62  ;;  %4430 = vmatpush1.bf16.msra.mxu0 %v6438_v41  ;;  %v6387_v62 = vld [vmem:[#allocation6 + $0x340] ss:$8 sps:$4 sm:$0xff]   ;;  %v6465_v41 = vld [vmem:[#allocation12 + $0x60] ss:$8 sps:$4 sm:$0xff]  }
 0x2d4   :  { %4141 = vmatprep.subr.bf16.mxu1 %v6371_v0  ;;  %v6392_v0 = vld [vmem:[#allocation6 + $0x354] ss:$8 sps:$4 sm:$0xff]  }
 0x2d5   :  { %v3327_v3 = vpop.f32.mrb[16].mxu1 }
 0x2d6   :  { %v7013_v4 = vadd.f32 %v3327_v3, %v3288_v63  ;;  %v5590_v6 = vpop.f32.mrb[17].mxu1  ;;  %v6398_v3 = vld [vmem:[#allocation6 + $0x374] ss:$8 sps:$4 sm:$0xff]  }
 0x2d7   :  { %4142 = vmatpush1.bf16.msra.mxu1 %v6369_v1  ;;  %v3330_v8 = vpop.f32.mrb[18].mxu1  ;;  %v6390_v1 = vld [vmem:[#allocation6 + $0x350] ss:$8 sps:$4 sm:$0xff]  }
 0x2d8   :  { %4143 = vmatprep.subr.bf16.mxu1 %v6374_v2  ;;  %v5591_v15 = vpop.f32.mrb[19].mxu1  ;;  %v6395_v2 = vld [vmem:[#allocation6 + $0x364] ss:$8 sps:$4 sm:$0xff]   ;;  %v6396_v6 = vld [vmem:[#allocation6 + $0x370] ss:$8 sps:$4 sm:$0xff]  }
 0x2d9   :  { %v6441_v15 = vld [vmem:[#allocation9 + $0xe0] ss:$8 sps:$4 sm:$0xff]  }
 0x2db   :  { %4144 = vmatpush1.bf16.msra.mxu1 %v6372_v19  ;;  %v3339_v19 = vmax.f32 %v7013_v4, 0.0 }
 0x2dc   :  { %4154 = vmatprep.subr.bf16.mxu1 %v6377_v9  ;;  %v6443_v9 = vld [vmem:[#allocation9 + $0xe4] ss:$8 sps:$4 sm:$0xff]  }
 0x2dd   :  { %v3346_v8 = vpack.c.bf16 %v3339_v19, %v3339_v19  ;;  %4431 = vmatprep.subr.bf16.mxu0 %v6443_v9  ;;  %v6496_v9 = vld [vmem:[%s7087_s9] sm:$0xff]  }
 0x2de   :  { %4432 = vmatpush1.bf16.msra.mxu0 %v6441_v15 }
 0x2df   :  { %4433 = vmatprep.subr.bf16.mxu0 %v6446_v11  ;;  %v6497_v11 = vld [vmem:[%s7087_s9 + $0x48] sm:$0xff]  }
 0x2e2   :  { %4434 = vmatpush1.bf16.msra.mxu0 %v6444_v12  ;;  %v6498_v12 = vld [vmem:[%s7087_s9 + $0x8] sm:$0xff]  }
 0x2e3   :  { %4652 = vmatprep.subr.bf16.mxu0 %v6449_v14  ;;  %v6499_v14 = vld [vmem:[%s7087_s9 + $0x50] sm:$0xff]  }
 0x335   :  { %v3166_v46 = vpop.f32.mrb[4].mxu0 }
 0x336   :  { %v5596_v47 = vadd.f32 %v3166_v46, %v624_v44  ;;  %v3168_v49 = vpop.f32.mrb[5].mxu0  ;;  %v6473_v44 = vld [vmem:[#allocation12 + $0x84] ss:$8 sps:$4 sm:$0xff]   ;;  %v6476_v46 = vld [vmem:[#allocation12 + $0x94] ss:$8 sps:$4 sm:$0xff]  }
 0x337   :  { %v5597_v50 = vadd.f32 %v3168_v49, %v628_v45  ;;  %v3170_v51 = vpop.f32.mrb[6].mxu0  ;;  %v6471_v45 = vld [vmem:[#allocation12 + $0x80] ss:$8 sps:$4 sm:$0xff]   ;;  %v6479_v49 = vld [vmem:[#allocation12 + $0xa4] ss:$8 sps:$4 sm:$0xff]  }
 0x338   :  { %v3337_v63 = vmax.f32 %v5596_v47, 0.0  ;;  %v3171_v52 = vpop.f32.mrb[7].mxu0  ;;  %v6474_v47 = vld [vmem:[#allocation12 + $0x90] ss:$8 sps:$4 sm:$0xff]   ;;  %v6482_v51 = vld [vmem:[#allocation12 + $0xb4] ss:$8 sps:$4 sm:$0xff]  }
 0x339   :  { %v3338_v53 = vmax.f32 %v5597_v50, 0.0  ;;  %v6477_v50 = vld [vmem:[#allocation12 + $0xa0] ss:$8 sps:$4 sm:$0xff]   ;;  %v6485_v52 = vld [vmem:[#allocation12 + $0xc4] ss:$8 sps:$4 sm:$0xff]  }
 0x33a   :  { %v3344_v56 = vpack.c.bf16 %v3337_v63, %v3337_v63  ;;  %v6480_v63 = vld [vmem:[#allocation12 + $0xb0] ss:$8 sps:$4 sm:$0xff]  }
 0x33b   :  { %v3345_v54 = vpack.c.bf16 %v3338_v53, %v3338_v53  ;;  %v6483_v53 = vld [vmem:[#allocation12 + $0xc0] ss:$8 sps:$4 sm:$0xff]  }
 0x33d   :  { %4145 = vmatprep.mubr.bf16.mxu1 %v3345_v54  ;;  %v6488_v54 = vld [vmem:[#allocation12 + $0xd4] ss:$8 sps:$4 sm:$0xff]  }
 0x33e   :  { %4146 = vmatmul.mubr.bf16.vlgmr.msra.gmra.mrb[20].mxu1 %v3344_v56  ;;  %v6491_v56 = vld [vmem:[#allocation12 + $0xe4] ss:$8 sps:$4 sm:$0xff]  }
 0x33f   :  { %4155 = vmatpush1.bf16.msra.mxu1 %v6375_v55  ;;  %4186 = vmatprep.mubr.bf16.mxu1 %v6733_v27  ;;  %v6393_v27 = vld [vmem:[#allocation6 + $0x360] ss:$8 sps:$4 sm:$0xff]   ;;  %v6486_v55 = vld [vmem:[#allocation12 + $0xd0] ss:$8 sps:$4 sm:$0xff]  }
 0x340   :  { %4156 = vmatprep.subr.bf16.mxu1 %v6380_v57  ;;  %v6489_v57 = vld [vmem:[#allocation12 + $0xe0] ss:$8 sps:$4 sm:$0xff]  }
 0x343   :  { %4157 = vmatpush1.bf16.msra.mxu1 %v6378_v10  ;;  %v6494_v10 = vld [vmem:[#allocation12 + $0xf4] ss:$8 sps:$4 sm:$0xff]  }
 0x344   :  { %4158 = vmatprep.subr.bf16.mxu1 %v6383_v5  ;;  %v6492_v5 = vld [vmem:[#allocation12 + $0xf0] ss:$8 sps:$4 sm:$0xff]  }
 0x347   :  { %4159 = vmatpush1.bf16.msra.mxu1 %v6381_v58  ;;  %v6495_v58 = vld [vmem:[%s7087_s9 + $0x40] sm:$0xff]  }
 0x348   :  { %4160 = vmatprep.subr.bf16.mxu1 %v6386_v59  ;;  %v4231_v59 = vld [vmem:[#allocation10] sm:$0x3] }
 0x34b   :  { %4161 = vmatpush1.bf16.msra.mxu1 %v6384_v60  ;;  %v4236_v60 = vrot.slane %v4231_v59, %v6992_v7 }
 0x34c   :  { %4162 = vmatprep.subr.bf16.mxu1 %v6389_v61  ;;  %v4240_v61 = vrot.slane %v4231_v59, %v6997_v48 }
 0x34f   :  { %4163 = vmatpush1.bf16.msra.mxu1 %v6387_v62 }
 0x350   :  { %4164 = vmatprep.subr.bf16.mxu1 %v6392_v0 }
 0x353   :  { %4165 = vmatpush1.bf16.msra.mxu1 %v6390_v1 }
 0x354   :  { %4166 = vmatprep.subr.bf16.mxu1 %v6395_v2 }
 0x357   :  { %4167 = vmatpush1.bf16.msra.mxu1 %v6393_v27 }
 0x358   :  { %4168 = vmatprep.subr.bf16.mxu1 %v6398_v3 }
 0x35b   :  { %4169 = vmatpush1.bf16.msra.mxu1 %v6396_v6 }
 0x35e   :  { %4187 = vmatmul.mubr.bf16.vlgmr.msra.gmra.mrb[20].mxu1 %v3346_v8 }
 0x431   :  { %v4188_v4 = vpop.f32.mrb[20].mxu1 }
 0x432   :  { %v5598_v20 = vadd.f32 %v4188_v4, %v3464_v16  ;;  %v4190_v21 = vpop.f32.mrb[21].mxu1  ;;  %v6501_v16 = vld [vmem:[%s7087_s9 + $0x58] sm:$0xff]   ;;  %v6503_v4 = vld [vmem:[%s7087_s9 + $0x60] sm:$0xff]  }
 0x433   :  { %v5599_v22 = vadd.f32 %v4190_v21, %v3468_v18  ;;  %v4192_v23 = vpop.f32.mrb[22].mxu1  ;;  %v6502_v18 = vld [vmem:[%s7087_s9 + $0x18] sm:$0xff]   ;;  %v6505_v21 = vld [vmem:[%s7087_s9 + $0x68] sm:$0xff]  }
 0x434   :  { %v4195_v24 = vmax.f32 %v5598_v20, 0.0  ;;  %v4193_v25 = vpop.f32.mrb[23].mxu1  ;;  %v6504_v20 = vld [vmem:[%s7087_s9 + $0x20] sm:$0xff]   ;;  %v6507_v23 = vld [vmem:[%s7087_s9 + $0x70] sm:$0xff]  }
 0x435   :  { %v4196_v13 = vmax.f32 %v5599_v22, 0.0  ;;  %v6506_v22 = vld [vmem:[%s7087_s9 + $0x28] sm:$0xff]   ;;  %v6509_v25 = vld [vmem:[%s7087_s9 + $0x78] sm:$0xff]  }
 0x436   :  { %v4197_v29 = vpack.c.bf16 %v4195_v24, %v4195_v24  ;;  %v6508_v24 = vld [vmem:[%s7087_s9 + $0x30] sm:$0xff]  }
 0x437   :  { %v4198_v26 = vpack.c.bf16 %v4196_v13, %v4196_v13  ;;  %v6510_v13 = vld [vmem:[%s7087_s9 + $0x38] sm:$0xff]  }
 0x439   :  { %4435 = vmatprep.mubr.bf16.mxu0 %v4198_v26  ;;  %v4480_v26 = vld [vmem:[#allocation13] sm:$0x3] }
 0x43a   :  { %4436 = vmatmul.mubr.bf16.vlgmr.msra.gmra.mrb[8].mxu0 %v4197_v29  ;;  %v4489_v29 = vrot.slane %v4480_v26, %v6997_v48 }
 0x43b   :  { %4653 = vmatpush1.bf16.msra.mxu0 %v6447_v28  ;;  %v4485_v28 = vrot.slane %v4480_v26, %v6992_v7 }
 0x43c   :  { %4654 = vmatprep.subr.bf16.mxu0 %v6452_v31 }
 0x43f   :  { %4655 = vmatpush1.bf16.msra.mxu0 %v6450_v32 }
 0x440   :  { %4656 = vmatprep.subr.bf16.mxu0 %v6455_v17 }
 0x443   :  { %4657 = vmatpush1.bf16.msra.mxu0 %v6453_v33 }
 0x444   :  { %4658 = vmatprep.subr.bf16.mxu0 %v6458_v34 }
 0x447   :  { %4659 = vmatpush1.bf16.msra.mxu0 %v6456_v35 }
 0x448   :  { %4660 = vmatprep.subr.bf16.mxu0 %v6461_v36 }
 0x44b   :  { %4661 = vmatpush1.bf16.msra.mxu0 %v6459_v37 }
 0x44c   :  { %4662 = vmatprep.subr.bf16.mxu0 %v6464_v38 }
 0x44f   :  { %4663 = vmatpush1.bf16.msra.mxu0 %v6462_v39 }
 0x450   :  { %4664 = vmatprep.subr.bf16.mxu0 %v6467_v40 }
 0x453   :  { %4665 = vmatpush1.bf16.msra.mxu0 %v6465_v41  ;;  %v5458_v41 = vld [vmem:[#allocation15] ss:$0 sm:$0xff] }
 0x454   :  { %4666 = vmatprep.subr.bf16.mxu0 %v6470_v42 }
 0x457   :  { %4667 = vmatpush1.bf16.msra.mxu0 %v6468_v43 }
 0x458   :  { %4668 = vmatprep.subr.bf16.mxu0 %v6473_v44 }
 0x45b   :  { %4669 = vmatpush1.bf16.msra.mxu0 %v6471_v45 }
 0x45c   :  { %4670 = vmatprep.subr.bf16.mxu0 %v6476_v46 }
 0x45f   :  { %4671 = vmatpush1.bf16.msra.mxu0 %v6474_v47 }
 0x460   :  { %4672 = vmatprep.subr.bf16.mxu0 %v6479_v49 }
 0x463   :  { %4673 = vmatpush1.bf16.msra.mxu0 %v6477_v50 }
 0x464   :  { %4674 = vmatprep.subr.bf16.mxu0 %v6482_v51 }
 0x467   :  { %4675 = vmatpush1.bf16.msra.mxu0 %v6480_v63 }
 0x468   :  { %4676 = vmatprep.subr.bf16.mxu0 %v6485_v52 }
 0x46b   :  { %4677 = vmatpush1.bf16.msra.mxu0 %v6483_v53 }
 0x46c   :  { %4678 = vmatprep.subr.bf16.mxu0 %v6488_v54 }
 0x46f   :  { %4679 = vmatpush1.bf16.msra.mxu0 %v6486_v55 }
 0x470   :  { %4680 = vmatprep.subr.bf16.mxu0 %v6491_v56 }
 0x473   :  { %4681 = vmatpush1.bf16.msra.mxu0 %v6489_v57 }
 0x474   :  { %4682 = vmatprep.subr.bf16.mxu0 %v6494_v10 }
 0x477   :  { %4683 = vmatpush1.bf16.msra.mxu0 %v6492_v5 }
 0x478   :  { %5550 = vmatprep.subr.bf16.mxu0 %v6495_v58 }
 0x50d   :  { %v4437_v62 = vpop.f32.mrb[8].mxu0 }
 0x50e   :  { %v4438_v0 = vadd.f32 %v4437_v62, %v4236_v60  ;;  %v4439_v1 = vpop.f32.mrb[9].mxu0 }
 0x50f   :  { %v4440_v2 = vadd.f32 %v4439_v1, %v4240_v61  ;;  %v4441_v27 = vpop.f32.mrb[10].mxu0 }
 0x510   :  { %v4444_v3 = vmax.f32 %v4438_v0, 0.0  ;;  %v4442_v6 = vpop.f32.mrb[11].mxu0 }
 0x511   :  { %v4445_v19 = vmax.f32 %v4440_v2, 0.0 }
 0x512   :  { %v4446_v15 = vpack.c.bf16 %v4444_v3, %v4444_v3 }
 0x513   :  { %v4447_v8 = vpack.c.bf16 %v4445_v19, %v4445_v19 }
 0x515   :  { %4684 = vmatprep.mubr.bf16.mxu0 %v4447_v8 }
 0x516   :  { %4685 = vmatmul.mubr.bf16.vlgmr.msra.gmra.mrb[12].mxu0 %v4446_v15 }
 0x517   :  { %5551 = vmatpush3.bf16.msra.mxu0 %v6496_v9 }
 0x518   :  { %5552 = vmatprep.subr.bf16.mxu0 %v6497_v11 }
 0x51b   :  { %5553 = vmatpush3.bf16.msra.mxu0 %v6498_v12 }
 0x51c   :  { %5554 = vmatprep.subr.bf16.mxu0 %v6499_v14 }
 0x51f   :  { %5555 = vmatpush3.bf16.msra.mxu0 %v6500_v30 }
 0x520   :  { %5556 = vmatprep.subr.bf16.mxu0 %v6501_v16 }
 0x523   :  { %5557 = vmatpush3.bf16.msra.mxu0 %v6502_v18 }
 0x524   :  { %5558 = vmatprep.subr.bf16.mxu0 %v6503_v4 }
 0x527   :  { %5559 = vmatpush3.bf16.msra.mxu0 %v6504_v20 }
 0x528   :  { %5560 = vmatprep.subr.bf16.mxu0 %v6505_v21 }
 0x52b   :  { %5561 = vmatpush3.bf16.msra.mxu0 %v6506_v22 }
 0x52c   :  { %5562 = vmatprep.subr.bf16.mxu0 %v6507_v23 }
 0x52f   :  { %5563 = vmatpush3.bf16.msra.mxu0 %v6508_v24 }
 0x530   :  { %5564 = vmatprep.subr.bf16.mxu0 %v6509_v25 }
 0x533   :  { %5565 = vmatpush3.bf16.msra.mxu0 %v6510_v13 }
 0x5e9   :  { %v4686_v31 = vpop.f32.mrb[12].mxu0 }
 0x5ea   :  { %v4687_v32 = vadd.f32 %v4686_v31, %v4485_v28  ;;  %v4688_v17 = vpop.f32.mrb[13].mxu0 }
 0x5eb   :  { %v4689_v33 = vadd.f32 %v4688_v17, %v4489_v29  ;;  %v4690_v34 = vpop.f32.mrb[14].mxu0 }
 0x5ec   :  { %v4693_v35 = vmax.f32 %v4687_v32, 0.0  ;;  %v4691_v36 = vpop.f32.mrb[15].mxu0 }
 0x5ed   :  { %v4694_v37 = vmax.f32 %v4689_v33, 0.0 }
 0x5ee   :  { %v4695_v39 = vpack.c.bf16 %v4693_v35, %v4693_v35 }
 0x5ef   :  { %v4696_v38 = vpack.c.bf16 %v4694_v37, %v4694_v37 }
 0x5f1   :  { %4864 = vmatprep.mubr.bf16.mxu0 %v4696_v38 }
 0x5f2   :  { %4865 = vmatmul.mubr.bf16.vlgmr.msra.gmra.mrb[16].mxu0 %v4695_v39 }
 0x6c5   :  { %v5566_v40 = vpop.f32.mrb[16].mxu0 }
 0x6c6   :  { %v5567_v42 = vpop.f32.mrb[17].mxu0 }
 0x6c7   :  { %v5568_v43 = vadd.f32 %v5567_v42, %v5566_v40  ;;  %v5569_v44 = vpop.f32.mrb[18].mxu0 }
 0x6c8   :  { %v5570_v7 = vpop.f32.mrb[19].mxu0 }
 0x6c9   :  { %v4867_v48 = vadd.f32 %v5568_v43, %v5458_v41 }
 0x6cb   :  { %4873 = vst.msk [vmem:[%s7089_s11] sm:$0xff] %vm4872_vm1, %v4867_v48 }
 0x6cc   :  { %4878 = vsyncpa [#allocation3], 1 }
 0x6cd   :  { %4879 = vsyncpa [#allocation5], 1 }
 0x6ce   :  { %4880 = vsyncpa [#allocation8], 1 }
 0x6cf   :  { %4881 = vsyncpa [#allocation11], 1 }
 0x6d0   :  { %4882 = vsyncpa [#allocation14], 1 }

</bundles_post_ra>
